<compile_context>
chip_gen: v6e
topology: v6e:2x2x1
jax: 0.10.0
libtpu: 0.0.40
codegen_flags: <defaults>
</compile_context>

<pallas_src>
import jax
import jax.numpy as jnp
from jax.experimental import pallas as pl
from jax.experimental.pallas import tpu as pltpu

N_CLASSES = 10  # module default `n_classes=N_CLASSES`


# ---------------------------------------------------------------------------
# Pallas kernel
# ---------------------------------------------------------------------------
def vanilla_classifier_kernel(x_ref, w1_ref, b1_ref, w2_ref, b2_ref,
                              fw1_ref, fb1_ref, fw2_ref, fb2_ref, out_ref):
    # x_ref : (bn, T, C_in) f32                  out_ref: (bn, n_cls_pad) f32
    # w1_ref: (K, C_in, H) bf16   b1: (1, H) f32
    # w2_ref: (K, H,    H) bf16   b2: (1, H) f32
    # fw1   : (H, Hc)      bf16   fb1: (1, Hc) f32
    # fw2   : (Hc, ncls_p) bf16   fb2: (1, ncls_p) f32
    blk_n, t_len0, c_in = x_ref.shape

    def conv_relu(x_rows, t_len, w_ref, b_ref):
        """'same'-padded Conv1d + ReLU on (rows, C) channels-last activations.

        Rows are sample-major / time-minor.  Each of the K taps is a sublane
        rotation (XLU) of the activation block; rows whose source time index
        falls outside [0, t_len) are zeroed (VPU select) so the per-sample zero
        padding of torch.nn.Conv1d is reproduced exactly, then the tap is
        contracted on the MXU into a float32 accumulator.  No im2col scratch.
        """
        rows, c = x_rows.shape
        k_taps = w_ref.shape[0]
        pad = k_taps // 2                      # odd k_size -> 'same' padding
        h_out = w_ref.shape[2]
        # time index of every row within its own sample (for boundary masking)
        t_idx = jax.lax.broadcasted_iota(jnp.int32, (rows, 1), 0) % t_len
        acc = jnp.zeros((rows, h_out), jnp.float32)
        for k in range(k_taps):                # static, fully unrolled taps
            s = k - pad                        # this tap reads x[t + s]
            shifted = x_rows if s == 0 else pltpu.roll(
                x_rows, shift=(-s) % rows, axis=0)
            valid = (t_idx + s >= 0) & (t_idx + s < t_len)
            tap = jnp.where(valid, shifted, 0.0)
            acc += jnp.dot(tap.astype(jnp.bfloat16), w_ref[k],
                           preferred_element_type=jnp.float32)
        return jnp.maximum(acc + b_ref[...], 0.0)      # bias + ReLU stay float32

    def group_rows(y, g):
        """(R, C) -> g views of shape (R//g, C): row j of every g consecutive rows.
        Channel (lane) axis never changes width."""
        r, c = y.shape
        y3 = y.reshape(r // g, g, c)
        return [y3[:, j, :] for j in range(g)]

    def maxpool4(y):
        a, b, c_, d = group_rows(y, 4)
        return jnp.maximum(jnp.maximum(a, b), jnp.maximum(c_, d))

    # ---- feature extractor: conv -> relu -> pool(4) -> conv -> relu -> pool(4) ----
    x_rows = x_ref[...].reshape(blk_n * t_len0, c_in)
    y = conv_relu(x_rows, t_len0, w1_ref, b1_ref)            # (bn*T,    H)
    y = maxpool4(y)                                          # (bn*T/4,  H)
    t1 = t_len0 // 4
    y = conv_relu(y, t1, w2_ref, b2_ref)                     # (bn*T/4,  H)
    y = maxpool4(y)                                          # (bn*T/16, H)

    # ---- mean over time -> (bn, H) features ----
    t2 = t1 // 4
    feat = sum(group_rows(y, t2)) * (1.0 / t2)               # (bn, H)

    # ---- classifier head: Linear -> ReLU -> Linear (lane-dense padded output) ----
    h = jnp.maximum(
        jnp.dot(feat.astype(jnp.bfloat16), fw1_ref[...],
                preferred_element_type=jnp.float32) + fb1_ref[...], 0.0)
    out_ref[...] = jnp.dot(h.astype(jnp.bfloat16), fw2_ref[...],
                           preferred_element_type=jnp.float32) + fb2_ref[...]


# ---------------------------------------------------------------------------
# Wrapper (layout glue + pallas_call)
# ---------------------------------------------------------------------------
def vanilla_classifier_forward(sig_in_nct, params, block_n=None):
    """sig_in_nct: [N, C_in, T] float32 (PyTorch layout). Returns logits [N, n_classes]."""
    w1, b1, w2, b2, fw1, fb1, fw2, fb2 = params
    N, c_in, T = sig_in_nct.shape
    h_dim, _, k_size = w1.shape
    h_cls = fw1.shape[0]
    n_classes = fw2.shape[0]
    assert T % 16 == 0, "both MaxPool1d(4) stages must divide T exactly"
    assert k_size % 2 == 1, "'same' padding path assumes odd kernel size"

    # ---- batch-grid sizing: ~512 activation rows per step, multiples of 8 samples;
    #      never splits channel dims.  Falls back to whole-batch for toy sizes. ----
    if block_n is None:
        tgt = -(-max(8, -(-512 // T)) // 8) * 8
        block_n = tgt if (tgt <= N and N % tgt == 0) else N
    grid = (N // block_n,)

    # ---- layout glue: channels-last activations, per-tap (K, C_in, C_out) conv
    #      weights, (in, out) linear weights; matmul weights pre-cast to bf16,
    #      biases stay float32.  Classes padded to a 128-lane multiple. ----
    x = jnp.transpose(sig_in_nct, (0, 2, 1)).astype(jnp.float32)      # (N, T, C_in)
    w1f = jnp.transpose(w1, (2, 1, 0)).astype(jnp.bfloat16)           # (K, C_in, H)
    w2f = jnp.transpose(w2, (2, 1, 0)).astype(jnp.bfloat16)           # (K, H, H)
    fw1f = fw1.T.astype(jnp.bfloat16)                                 # (H, Hc)
    n_cls_pad = int(pl.cdiv(n_classes, 128)) * 128
    fw2f = jnp.zeros((h_cls, n_cls_pad), jnp.bfloat16).at[:, :n_classes].set(
        fw2.T.astype(jnp.bfloat16))
    fb2p = jnp.zeros((1, n_cls_pad), jnp.float32).at[:, :n_classes].set(
        fb2.reshape(1, -1).astype(jnp.float32))
    b1r = b1.reshape(1, -1).astype(jnp.float32)
    b2r = b2.reshape(1, -1).astype(jnp.float32)
    fb1r = fb1.reshape(1, -1).astype(jnp.float32)

    def rep(a):   # weights/biases: full-shape block, constant index -> fetched once
        nd = a.ndim
        return pl.BlockSpec(a.shape, lambda b, _nd=nd: (0,) * _nd)

    out_pad = pl.pallas_call(
        vanilla_classifier_kernel,
        out_shape=jax.ShapeDtypeStruct((N, n_cls_pad), jnp.float32),
        grid=grid,
        in_specs=[pl.BlockSpec((block_n, T, c_in), lambda b: (b, 0, 0)),
                  rep(w1f), rep(b1r), rep(w2f), rep(b2r),
                  rep(fw1f), rep(fb1r), rep(fw2f), rep(fb2p)],
        out_specs=pl.BlockSpec((block_n, n_cls_pad), lambda b: (b, 0)),
        compiler_params=pltpu.CompilerParams(
            dimension_semantics=("parallel",),
            vmem_limit_bytes=32 * 1024 * 1024),
    )(x, w1f, b1r, w2f, b2r, fw1f, fb1r, fw2f, fb2p)
    return out_pad[:, :n_classes]


# ---------------------------------------------------------------------------
# Pure-JAX float32 reference (same math, XLA ops) for a sanity check.
# The kernel uses bf16 matmul operands, hence the 2e-2 tolerance below.
# ---------------------------------------------------------------------------
def reference_forward(sig_in_nct, params):
    w1, b1, w2, b2, fw1, fb1, fw2, fb2 = params
    x = jnp.transpose(sig_in_nct, (0, 2, 1)).astype(jnp.float32)
    w1_k = jnp.transpose(w1, (2, 1, 0))
    w2_k = jnp.transpose(w2, (2, 1, 0))

    def conv(xb, wk, b):
        K = wk.shape[0]
        pad = K // 2
        T = xb.shape[1]
        xp = jnp.pad(xb, ((0, 0), (pad, pad), (0, 0)))
        acc = sum(jnp.einsum('ntc,co->nto', xp[:, k:k + T, :], wk[k]) for k in range(K))
        return acc + b.reshape(1, 1, -1)

    def pool(yb):
        n, t, c = yb.shape
        return jnp.max(yb[:, :t // 4 * 4, :].reshape(n, t // 4, 4, c), axis=2)

    y = pool(jax.nn.relu(conv(x, w1_k, b1)))
    y = pool(jax.nn.relu(conv(y, w2_k, b2)))
    feat = jnp.mean(y, axis=1)
    h = jax.nn.relu(feat @ fw1.T + fb1)
    return h @ fw2.T + fb2


# ---------------------------------------------------------------------------
if __name__ == "__main__":
    ch_in, h_dim, h_dim_classifier, k_size = 2, 8, 128, 5
    n_classes = N_CLASSES
    N, T = 2, 64  # T divisible by 4*4 so both MaxPool1d(4) layers are exact

    key = jax.random.PRNGKey(0)
    ks = jax.random.split(key, 9)

    def uinit(k, shape, fan_in):
        bound = float(fan_in) ** -0.5
        return jax.random.uniform(k, shape, jnp.float32, -bound, bound)

    # torch parameter layouts: Conv1d weight (O, I, K); Linear weight (out, in)
    w1 = uinit(ks[0], (h_dim, ch_in, k_size), ch_in * k_size)
    b1 = uinit(ks[1], (h_dim,), ch_in * k_size)
    w2 = uinit(ks[2], (h_dim, h_dim, k_size), h_dim * k_size)
    b2 = uinit(ks[3], (h_dim,), h_dim * k_size)
    fw1 = uinit(ks[4], (h_dim_classifier, h_dim), h_dim)
    fb1 = uinit(ks[5], (h_dim_classifier,), h_dim)
    fw2 = uinit(ks[6], (n_classes, h_dim_classifier), h_dim_classifier)
    fb2 = uinit(ks[7], (n_classes,), h_dim_classifier)
    params = (w1, b1, w2, b2, fw1, fb1, fw2, fb2)

    sig_in = jax.random.normal(ks[8], (N, ch_in, T), jnp.float32)   # [N, C, T]

    logits = jax.jit(vanilla_classifier_forward)(sig_in, params)
    logits = jax.block_until_ready(logits)

    ref = reference_forward(sig_in, params)
    assert logits.shape == (N, n_classes), logits.shape
    assert jnp.allclose(logits, ref, rtol=2e-2, atol=2e-2), "kernel/reference mismatch"
    print("KERNEL_OK")
</pallas_src>

<mosaic_0001>
module attributes {stable_mosaic.version = 11 : i64} {
  func.func @vanilla_classifier_kernel(%arg0: i32, %arg1: memref<2x64x2xf32, #tpu.memory_space<vmem>>, %arg2: memref<5x2x8xbf16, #tpu.memory_space<vmem>>, %arg3: memref<1x8xf32, #tpu.memory_space<vmem>>, %arg4: memref<5x8x8xbf16, #tpu.memory_space<vmem>>, %arg5: memref<1x8xf32, #tpu.memory_space<vmem>>, %arg6: memref<8x128xbf16, #tpu.memory_space<vmem>>, %arg7: memref<1x128xf32, #tpu.memory_space<vmem>>, %arg8: memref<128x128xbf16, #tpu.memory_space<vmem>>, %arg9: memref<1x128xf32, #tpu.memory_space<vmem>>, %arg10: memref<2x128xf32, #tpu.memory_space<vmem>>) attributes {dimension_semantics = [#tpu.dimension_semantics<parallel>], iteration_bounds = array<i64: 1>, scalar_prefetch = 0 : i64, scratch_operands = 0 : i64, tpu.core_type = #tpu.core_type<tc>, window_params = [{transform_indices = @transform_0, window_bounds = array<i64: 2, 64, 2>}, {pipeline_mode = #tpu.pipeline_mode<synchronous>, transform_indices = @transform_1, window_bounds = array<i64: 5, 2, 8>}, {pipeline_mode = #tpu.pipeline_mode<synchronous>, transform_indices = @transform_2, window_bounds = array<i64: 1, 8>}, {pipeline_mode = #tpu.pipeline_mode<synchronous>, transform_indices = @transform_3, window_bounds = array<i64: 5, 8, 8>}, {pipeline_mode = #tpu.pipeline_mode<synchronous>, transform_indices = @transform_4, window_bounds = array<i64: 1, 8>}, {pipeline_mode = #tpu.pipeline_mode<synchronous>, transform_indices = @transform_5, window_bounds = array<i64: 8, 128>}, {pipeline_mode = #tpu.pipeline_mode<synchronous>, transform_indices = @transform_6, window_bounds = array<i64: 1, 128>}, {pipeline_mode = #tpu.pipeline_mode<synchronous>, transform_indices = @transform_7, window_bounds = array<i64: 128, 128>}, {pipeline_mode = #tpu.pipeline_mode<synchronous>, transform_indices = @transform_8, window_bounds = array<i64: 1, 128>}, {transform_indices = @transform_9, window_bounds = array<i64: 2, 128>}]} {
    %c0 = arith.constant 0 : index
    %c0_0 = arith.constant 0 : index
    %c0_1 = arith.constant 0 : index
    %0 = vector.load %arg1[%c0, %c0_0, %c0_1] : memref<2x64x2xf32, #tpu.memory_space<vmem>>, vector<2x64x2xf32>
    %1 = vector.shape_cast %0 : vector<2x64x2xf32> to vector<128x2xf32>
    %2 = tpu.iota {dimensions = array<i32: 0>} : vector<128x1xi32>
    %c64_i32 = arith.constant 64 : i32
    %c0_i32 = arith.constant 0 : i32
    %3 = arith.cmpi eq, %c64_i32, %c0_i32 : i32
    %c1_i32 = arith.constant 1 : i32
    %4 = arith.select %3, %c1_i32, %c64_i32 : i32
    %5 = vector.broadcast %4 : i32 to vector<128x1xi32>
    %6 = arith.remsi %2, %5 : vector<128x1xi32>
    %c0_i32_2 = arith.constant 0 : i32
    %7 = vector.broadcast %c0_i32_2 : i32 to vector<128x1xi32>
    %8 = arith.cmpi ne, %6, %7 : vector<128x1xi32>
    %c0_i32_3 = arith.constant 0 : i32
    %9 = vector.broadcast %c0_i32_3 : i32 to vector<128x1xi32>
    %10 = arith.cmpi slt, %6, %9 : vector<128x1xi32>
    %c0_i32_4 = arith.constant 0 : i32
    %11 = arith.cmpi slt, %4, %c0_i32_4 : i32
    %12 = vector.broadcast %11 : i1 to vector<128x1xi1>
    %13 = vector.broadcast %12 : vector<128x1xi1> to vector<128x1xi1>
    %14 = arith.xori %10, %13 : vector<128x1xi1>
    %15 = arith.andi %14, %8 : vector<128x1xi1>
    %16 = vector.broadcast %4 : i32 to vector<128x1xi32>
    %17 = arith.addi %6, %16 : vector<128x1xi32>
    %18 = arith.select %15, %17, %6 : vector<128x1xi1>, vector<128x1xi32>
    %cst = arith.constant 0.000000e+00 : f32
    %19 = vector.broadcast %cst : f32 to vector<128x8xf32>
    %c2_i32 = arith.constant 2 : i32
    %20 = tpu.dynamic_rotate %1 by %c2_i32 dim 0 : vector<128x2xf32>, i32 -> vector<128x2xf32>
    %c-2_i32 = arith.constant -2 : i32
    %21 = vector.broadcast %c-2_i32 : i32 to vector<128x1xi32>
    %22 = arith.addi %18, %21 : vector<128x1xi32>
    %c0_i32_5 = arith.constant 0 : i32
    %23 = vector.broadcast %c0_i32_5 : i32 to vector<128x1xi32>
    %24 = arith.cmpi sge, %22, %23 : vector<128x1xi32>
    %c-2_i32_6 = arith.constant -2 : i32
    %25 = vector.broadcast %c-2_i32_6 : i32 to vector<128x1xi32>
    %26 = arith.addi %18, %25 : vector<128x1xi32>
    %c64_i32_7 = arith.constant 64 : i32
    %27 = vector.broadcast %c64_i32_7 : i32 to vector<128x1xi32>
    %28 = arith.cmpi slt, %26, %27 : vector<128x1xi32>
    %29 = arith.andi %24, %28 : vector<128x1xi1>
    %cst_8 = arith.constant 0.000000e+00 : f32
    %30 = vector.shape_cast %29 : vector<128x1xi1> to vector<128x1xi1>
    %31 = vector.broadcast %30 : vector<128x1xi1> to vector<128x2xi1>
    %32 = vector.broadcast %cst_8 : f32 to vector<128x2xf32>
    %33 = arith.select %31, %20, %32 : vector<128x2xi1>, vector<128x2xf32>
    %34 = arith.truncf %33 : vector<128x2xf32> to vector<128x2xbf16>
    %c0_9 = arith.constant 0 : index
    %c0_10 = arith.constant 0 : index
    %c0_11 = arith.constant 0 : index
    %35 = vector.load %arg2[%c0_9, %c0_10, %c0_11] : memref<5x2x8xbf16, #tpu.memory_space<vmem>>, vector<1x2x8xbf16>
    %36 = vector.shape_cast %35 : vector<1x2x8xbf16> to vector<2x8xbf16>
    %cst_12 = arith.constant dense<0.000000e+00> : vector<128x8xf32>
    %37 = tpu.matmul %34, %36, %cst_12 {dimension_numbers = #tpu.dot_dimension_numbers<[1], [0], [0], [1], [0, 0, 1, 1], [], []>} : vector<128x2xbf16>, vector<2x8xbf16>, vector<128x8xf32> -> vector<128x8xf32>
    %38 = arith.addf %19, %37 : vector<128x8xf32>
    %c1_i32_13 = arith.constant 1 : i32
    %39 = tpu.dynamic_rotate %1 by %c1_i32_13 dim 0 : vector<128x2xf32>, i32 -> vector<128x2xf32>
    %c-1_i32 = arith.constant -1 : i32
    %40 = vector.broadcast %c-1_i32 : i32 to vector<128x1xi32>
    %41 = arith.addi %18, %40 : vector<128x1xi32>
    %c0_i32_14 = arith.constant 0 : i32
    %42 = vector.broadcast %c0_i32_14 : i32 to vector<128x1xi32>
    %43 = arith.cmpi sge, %41, %42 : vector<128x1xi32>
    %c-1_i32_15 = arith.constant -1 : i32
    %44 = vector.broadcast %c-1_i32_15 : i32 to vector<128x1xi32>
    %45 = arith.addi %18, %44 : vector<128x1xi32>
    %c64_i32_16 = arith.constant 64 : i32
    %46 = vector.broadcast %c64_i32_16 : i32 to vector<128x1xi32>
    %47 = arith.cmpi slt, %45, %46 : vector<128x1xi32>
    %48 = arith.andi %43, %47 : vector<128x1xi1>
    %cst_17 = arith.constant 0.000000e+00 : f32
    %49 = vector.shape_cast %48 : vector<128x1xi1> to vector<128x1xi1>
    %50 = vector.broadcast %49 : vector<128x1xi1> to vector<128x2xi1>
    %51 = vector.broadcast %cst_17 : f32 to vector<128x2xf32>
    %52 = arith.select %50, %39, %51 : vector<128x2xi1>, vector<128x2xf32>
    %53 = arith.truncf %52 : vector<128x2xf32> to vector<128x2xbf16>
    %c1 = arith.constant 1 : index
    %c0_18 = arith.constant 0 : index
    %c0_19 = arith.constant 0 : index
    %54 = vector.load %arg2[%c1, %c0_18, %c0_19] : memref<5x2x8xbf16, #tpu.memory_space<vmem>>, vector<1x2x8xbf16>
    %55 = vector.shape_cast %54 : vector<1x2x8xbf16> to vector<2x8xbf16>
    %cst_20 = arith.constant dense<0.000000e+00> : vector<128x8xf32>
    %56 = tpu.matmul %53, %55, %cst_20 {dimension_numbers = #tpu.dot_dimension_numbers<[1], [0], [0], [1], [0, 0, 1, 1], [], []>} : vector<128x2xbf16>, vector<2x8xbf16>, vector<128x8xf32> -> vector<128x8xf32>
    %57 = arith.addf %38, %56 : vector<128x8xf32>
    %c0_i32_21 = arith.constant 0 : i32
    %58 = vector.broadcast %c0_i32_21 : i32 to vector<128x1xi32>
    %59 = arith.addi %18, %58 : vector<128x1xi32>
    %c0_i32_22 = arith.constant 0 : i32
    %60 = vector.broadcast %c0_i32_22 : i32 to vector<128x1xi32>
    %61 = arith.cmpi sge, %59, %60 : vector<128x1xi32>
    %c0_i32_23 = arith.constant 0 : i32
    %62 = vector.broadcast %c0_i32_23 : i32 to vector<128x1xi32>
    %63 = arith.addi %18, %62 : vector<128x1xi32>
    %c64_i32_24 = arith.constant 64 : i32
    %64 = vector.broadcast %c64_i32_24 : i32 to vector<128x1xi32>
    %65 = arith.cmpi slt, %63, %64 : vector<128x1xi32>
    %66 = arith.andi %61, %65 : vector<128x1xi1>
    %cst_25 = arith.constant 0.000000e+00 : f32
    %67 = vector.shape_cast %66 : vector<128x1xi1> to vector<128x1xi1>
    %68 = vector.broadcast %67 : vector<128x1xi1> to vector<128x2xi1>
    %69 = vector.broadcast %cst_25 : f32 to vector<128x2xf32>
    %70 = arith.select %68, %1, %69 : vector<128x2xi1>, vector<128x2xf32>
    %71 = arith.truncf %70 : vector<128x2xf32> to vector<128x2xbf16>
    %c2 = arith.constant 2 : index
    %c0_26 = arith.constant 0 : index
    %c0_27 = arith.constant 0 : index
    %72 = vector.load %arg2[%c2, %c0_26, %c0_27] : memref<5x2x8xbf16, #tpu.memory_space<vmem>>, vector<1x2x8xbf16>
    %73 = vector.shape_cast %72 : vector<1x2x8xbf16> to vector<2x8xbf16>
    %cst_28 = arith.constant dense<0.000000e+00> : vector<128x8xf32>
    %74 = tpu.matmul %71, %73, %cst_28 {dimension_numbers = #tpu.dot_dimension_numbers<[1], [0], [0], [1], [0, 0, 1, 1], [], []>} : vector<128x2xbf16>, vector<2x8xbf16>, vector<128x8xf32> -> vector<128x8xf32>
    %75 = arith.addf %57, %74 : vector<128x8xf32>
    %c127_i32 = arith.constant 127 : i32
    %76 = tpu.dynamic_rotate %1 by %c127_i32 dim 0 : vector<128x2xf32>, i32 -> vector<128x2xf32>
    %c1_i32_29 = arith.constant 1 : i32
    %77 = vector.broadcast %c1_i32_29 : i32 to vector<128x1xi32>
    %78 = arith.addi %18, %77 : vector<128x1xi32>
    %c0_i32_30 = arith.constant 0 : i32
    %79 = vector.broadcast %c0_i32_30 : i32 to vector<128x1xi32>
    %80 = arith.cmpi sge, %78, %79 : vector<128x1xi32>
    %c1_i32_31 = arith.constant 1 : i32
    %81 = vector.broadcast %c1_i32_31 : i32 to vector<128x1xi32>
    %82 = arith.addi %18, %81 : vector<128x1xi32>
    %c64_i32_32 = arith.constant 64 : i32
    %83 = vector.broadcast %c64_i32_32 : i32 to vector<128x1xi32>
    %84 = arith.cmpi slt, %82, %83 : vector<128x1xi32>
    %85 = arith.andi %80, %84 : vector<128x1xi1>
    %cst_33 = arith.constant 0.000000e+00 : f32
    %86 = vector.shape_cast %85 : vector<128x1xi1> to vector<128x1xi1>
    %87 = vector.broadcast %86 : vector<128x1xi1> to vector<128x2xi1>
    %88 = vector.broadcast %cst_33 : f32 to vector<128x2xf32>
    %89 = arith.select %87, %76, %88 : vector<128x2xi1>, vector<128x2xf32>
    %90 = arith.truncf %89 : vector<128x2xf32> to vector<128x2xbf16>
    %c3 = arith.constant 3 : index
    %c0_34 = arith.constant 0 : index
    %c0_35 = arith.constant 0 : index
    %91 = vector.load %arg2[%c3, %c0_34, %c0_35] : memref<5x2x8xbf16, #tpu.memory_space<vmem>>, vector<1x2x8xbf16>
    %92 = vector.shape_cast %91 : vector<1x2x8xbf16> to vector<2x8xbf16>
    %cst_36 = arith.constant dense<0.000000e+00> : vector<128x8xf32>
    %93 = tpu.matmul %90, %92, %cst_36 {dimension_numbers = #tpu.dot_dimension_numbers<[1], [0], [0], [1], [0, 0, 1, 1], [], []>} : vector<128x2xbf16>, vector<2x8xbf16>, vector<128x8xf32> -> vector<128x8xf32>
    %94 = arith.addf %75, %93 : vector<128x8xf32>
    %c126_i32 = arith.constant 126 : i32
    %95 = tpu.dynamic_rotate %1 by %c126_i32 dim 0 : vector<128x2xf32>, i32 -> vector<128x2xf32>
    %c2_i32_37 = arith.constant 2 : i32
    %96 = vector.broadcast %c2_i32_37 : i32 to vector<128x1xi32>
    %97 = arith.addi %18, %96 : vector<128x1xi32>
    %c0_i32_38 = arith.constant 0 : i32
    %98 = vector.broadcast %c0_i32_38 : i32 to vector<128x1xi32>
    %99 = arith.cmpi sge, %97, %98 : vector<128x1xi32>
    %c2_i32_39 = arith.constant 2 : i32
    %100 = vector.broadcast %c2_i32_39 : i32 to vector<128x1xi32>
    %101 = arith.addi %18, %100 : vector<128x1xi32>
    %c64_i32_40 = arith.constant 64 : i32
    %102 = vector.broadcast %c64_i32_40 : i32 to vector<128x1xi32>
    %103 = arith.cmpi slt, %101, %102 : vector<128x1xi32>
    %104 = arith.andi %99, %103 : vector<128x1xi1>
    %cst_41 = arith.constant 0.000000e+00 : f32
    %105 = vector.shape_cast %104 : vector<128x1xi1> to vector<128x1xi1>
    %106 = vector.broadcast %105 : vector<128x1xi1> to vector<128x2xi1>
    %107 = vector.broadcast %cst_41 : f32 to vector<128x2xf32>
    %108 = arith.select %106, %95, %107 : vector<128x2xi1>, vector<128x2xf32>
    %109 = arith.truncf %108 : vector<128x2xf32> to vector<128x2xbf16>
    %c4 = arith.constant 4 : index
    %c0_42 = arith.constant 0 : index
    %c0_43 = arith.constant 0 : index
    %110 = vector.load %arg2[%c4, %c0_42, %c0_43] : memref<5x2x8xbf16, #tpu.memory_space<vmem>>, vector<1x2x8xbf16>
    %111 = vector.shape_cast %110 : vector<1x2x8xbf16> to vector<2x8xbf16>
    %cst_44 = arith.constant dense<0.000000e+00> : vector<128x8xf32>
    %112 = tpu.matmul %109, %111, %cst_44 {dimension_numbers = #tpu.dot_dimension_numbers<[1], [0], [0], [1], [0, 0, 1, 1], [], []>} : vector<128x2xbf16>, vector<2x8xbf16>, vector<128x8xf32> -> vector<128x8xf32>
    %113 = arith.addf %94, %112 : vector<128x8xf32>
    %c0_45 = arith.constant 0 : index
    %c0_46 = arith.constant 0 : index
    %114 = vector.load %arg3[%c0_45, %c0_46] : memref<1x8xf32, #tpu.memory_space<vmem>>, vector<1x8xf32>
    %115 = vector.broadcast %114 : vector<1x8xf32> to vector<128x8xf32>
    %116 = arith.addf %113, %115 : vector<128x8xf32>
    %cst_47 = arith.constant 0.000000e+00 : f32
    %117 = vector.broadcast %cst_47 : f32 to vector<128x8xf32>
    %118 = arith.maximumf %116, %117 : vector<128x8xf32>
    %119 = vector.shape_cast %118 : vector<128x8xf32> to vector<32x4x8xf32>
    %120 = vector.extract_strided_slice %119 {offsets = [0, 0, 0], sizes = [32, 1, 8], strides = [1, 1, 1]} : vector<32x4x8xf32> to vector<32x1x8xf32>
    %121 = vector.shape_cast %120 : vector<32x1x8xf32> to vector<32x8xf32>
    %122 = vector.extract_strided_slice %119 {offsets = [0, 1, 0], sizes = [32, 1, 8], strides = [1, 1, 1]} : vector<32x4x8xf32> to vector<32x1x8xf32>
    %123 = vector.shape_cast %122 : vector<32x1x8xf32> to vector<32x8xf32>
    %124 = vector.extract_strided_slice %119 {offsets = [0, 2, 0], sizes = [32, 1, 8], strides = [1, 1, 1]} : vector<32x4x8xf32> to vector<32x1x8xf32>
    %125 = vector.shape_cast %124 : vector<32x1x8xf32> to vector<32x8xf32>
    %126 = vector.extract_strided_slice %119 {offsets = [0, 3, 0], sizes = [32, 1, 8], strides = [1, 1, 1]} : vector<32x4x8xf32> to vector<32x1x8xf32>
    %127 = vector.shape_cast %126 : vector<32x1x8xf32> to vector<32x8xf32>
    %128 = arith.maximumf %121, %123 : vector<32x8xf32>
    %129 = arith.maximumf %125, %127 : vector<32x8xf32>
    %130 = arith.maximumf %128, %129 : vector<32x8xf32>
    %131 = tpu.iota {dimensions = array<i32: 0>} : vector<32x1xi32>
    %c16_i32 = arith.constant 16 : i32
    %c0_i32_48 = arith.constant 0 : i32
    %132 = arith.cmpi eq, %c16_i32, %c0_i32_48 : i32
    %c1_i32_49 = arith.constant 1 : i32
    %133 = arith.select %132, %c1_i32_49, %c16_i32 : i32
    %134 = vector.broadcast %133 : i32 to vector<32x1xi32>
    %135 = arith.remsi %131, %134 : vector<32x1xi32>
    %c0_i32_50 = arith.constant 0 : i32
    %136 = vector.broadcast %c0_i32_50 : i32 to vector<32x1xi32>
    %137 = arith.cmpi ne, %135, %136 : vector<32x1xi32>
    %c0_i32_51 = arith.constant 0 : i32
    %138 = vector.broadcast %c0_i32_51 : i32 to vector<32x1xi32>
    %139 = arith.cmpi slt, %135, %138 : vector<32x1xi32>
    %c0_i32_52 = arith.constant 0 : i32
    %140 = arith.cmpi slt, %133, %c0_i32_52 : i32
    %141 = vector.broadcast %140 : i1 to vector<32x1xi1>
    %142 = vector.broadcast %141 : vector<32x1xi1> to vector<32x1xi1>
    %143 = arith.xori %139, %142 : vector<32x1xi1>
    %144 = arith.andi %143, %137 : vector<32x1xi1>
    %145 = vector.broadcast %133 : i32 to vector<32x1xi32>
    %146 = arith.addi %135, %145 : vector<32x1xi32>
    %147 = arith.select %144, %146, %135 : vector<32x1xi1>, vector<32x1xi32>
    %cst_53 = arith.constant 0.000000e+00 : f32
    %148 = vector.broadcast %cst_53 : f32 to vector<32x8xf32>
    %c2_i32_54 = arith.constant 2 : i32
    %149 = tpu.dynamic_rotate %130 by %c2_i32_54 dim 0 : vector<32x8xf32>, i32 -> vector<32x8xf32>
    %c-2_i32_55 = arith.constant -2 : i32
    %150 = vector.broadcast %c-2_i32_55 : i32 to vector<32x1xi32>
    %151 = arith.addi %147, %150 : vector<32x1xi32>
    %c0_i32_56 = arith.constant 0 : i32
    %152 = vector.broadcast %c0_i32_56 : i32 to vector<32x1xi32>
    %153 = arith.cmpi sge, %151, %152 : vector<32x1xi32>
    %c-2_i32_57 = arith.constant -2 : i32
    %154 = vector.broadcast %c-2_i32_57 : i32 to vector<32x1xi32>
    %155 = arith.addi %147, %154 : vector<32x1xi32>
    %c16_i32_58 = arith.constant 16 : i32
    %156 = vector.broadcast %c16_i32_58 : i32 to vector<32x1xi32>
    %157 = arith.cmpi slt, %155, %156 : vector<32x1xi32>
    %158 = arith.andi %153, %157 : vector<32x1xi1>
    %cst_59 = arith.constant 0.000000e+00 : f32
    %159 = vector.shape_cast %158 : vector<32x1xi1> to vector<32x1xi1>
    %160 = vector.broadcast %159 : vector<32x1xi1> to vector<32x8xi1>
    %161 = vector.broadcast %cst_59 : f32 to vector<32x8xf32>
    %162 = arith.select %160, %149, %161 : vector<32x8xi1>, vector<32x8xf32>
    %163 = arith.truncf %162 : vector<32x8xf32> to vector<32x8xbf16>
    %c0_60 = arith.constant 0 : index
    %c0_61 = arith.constant 0 : index
    %c0_62 = arith.constant 0 : index
    %164 = vector.load %arg4[%c0_60, %c0_61, %c0_62] : memref<5x8x8xbf16, #tpu.memory_space<vmem>>, vector<1x8x8xbf16>
    %165 = vector.shape_cast %164 : vector<1x8x8xbf16> to vector<8x8xbf16>
    %cst_63 = arith.constant dense<0.000000e+00> : vector<32x8xf32>
    %166 = tpu.matmul %163, %165, %cst_63 {dimension_numbers = #tpu.dot_dimension_numbers<[1], [0], [0], [1], [0, 0, 1, 1], [], []>} : vector<32x8xbf16>, vector<8x8xbf16>, vector<32x8xf32> -> vector<32x8xf32>
    %167 = arith.addf %148, %166 : vector<32x8xf32>
    %c1_i32_64 = arith.constant 1 : i32
    %168 = tpu.dynamic_rotate %130 by %c1_i32_64 dim 0 : vector<32x8xf32>, i32 -> vector<32x8xf32>
    %c-1_i32_65 = arith.constant -1 : i32
    %169 = vector.broadcast %c-1_i32_65 : i32 to vector<32x1xi32>
    %170 = arith.addi %147, %169 : vector<32x1xi32>
    %c0_i32_66 = arith.constant 0 : i32
    %171 = vector.broadcast %c0_i32_66 : i32 to vector<32x1xi32>
    %172 = arith.cmpi sge, %170, %171 : vector<32x1xi32>
    %c-1_i32_67 = arith.constant -1 : i32
    %173 = vector.broadcast %c-1_i32_67 : i32 to vector<32x1xi32>
    %174 = arith.addi %147, %173 : vector<32x1xi32>
    %c16_i32_68 = arith.constant 16 : i32
    %175 = vector.broadcast %c16_i32_68 : i32 to vector<32x1xi32>
    %176 = arith.cmpi slt, %174, %175 : vector<32x1xi32>
    %177 = arith.andi %172, %176 : vector<32x1xi1>
    %cst_69 = arith.constant 0.000000e+00 : f32
    %178 = vector.shape_cast %177 : vector<32x1xi1> to vector<32x1xi1>
    %179 = vector.broadcast %178 : vector<32x1xi1> to vector<32x8xi1>
    %180 = vector.broadcast %cst_69 : f32 to vector<32x8xf32>
    %181 = arith.select %179, %168, %180 : vector<32x8xi1>, vector<32x8xf32>
    %182 = arith.truncf %181 : vector<32x8xf32> to vector<32x8xbf16>
    %c1_70 = arith.constant 1 : index
    %c0_71 = arith.constant 0 : index
    %c0_72 = arith.constant 0 : index
    %183 = vector.load %arg4[%c1_70, %c0_71, %c0_72] : memref<5x8x8xbf16, #tpu.memory_space<vmem>>, vector<1x8x8xbf16>
    %184 = vector.shape_cast %183 : vector<1x8x8xbf16> to vector<8x8xbf16>
    %cst_73 = arith.constant dense<0.000000e+00> : vector<32x8xf32>
    %185 = tpu.matmul %182, %184, %cst_73 {dimension_numbers = #tpu.dot_dimension_numbers<[1], [0], [0], [1], [0, 0, 1, 1], [], []>} : vector<32x8xbf16>, vector<8x8xbf16>, vector<32x8xf32> -> vector<32x8xf32>
    %186 = arith.addf %167, %185 : vector<32x8xf32>
    %c0_i32_74 = arith.constant 0 : i32
    %187 = vector.broadcast %c0_i32_74 : i32 to vector<32x1xi32>
    %188 = arith.addi %147, %187 : vector<32x1xi32>
    %c0_i32_75 = arith.constant 0 : i32
    %189 = vector.broadcast %c0_i32_75 : i32 to vector<32x1xi32>
    %190 = arith.cmpi sge, %188, %189 : vector<32x1xi32>
    %c0_i32_76 = arith.constant 0 : i32
    %191 = vector.broadcast %c0_i32_76 : i32 to vector<32x1xi32>
    %192 = arith.addi %147, %191 : vector<32x1xi32>
    %c16_i32_77 = arith.constant 16 : i32
    %193 = vector.broadcast %c16_i32_77 : i32 to vector<32x1xi32>
    %194 = arith.cmpi slt, %192, %193 : vector<32x1xi32>
    %195 = arith.andi %190, %194 : vector<32x1xi1>
    %cst_78 = arith.constant 0.000000e+00 : f32
    %196 = vector.shape_cast %195 : vector<32x1xi1> to vector<32x1xi1>
    %197 = vector.broadcast %196 : vector<32x1xi1> to vector<32x8xi1>
    %198 = vector.broadcast %cst_78 : f32 to vector<32x8xf32>
    %199 = arith.select %197, %130, %198 : vector<32x8xi1>, vector<32x8xf32>
    %200 = arith.truncf %199 : vector<32x8xf32> to vector<32x8xbf16>
    %c2_79 = arith.constant 2 : index
    %c0_80 = arith.constant 0 : index
    %c0_81 = arith.constant 0 : index
    %201 = vector.load %arg4[%c2_79, %c0_80, %c0_81] : memref<5x8x8xbf16, #tpu.memory_space<vmem>>, vector<1x8x8xbf16>
    %202 = vector.shape_cast %201 : vector<1x8x8xbf16> to vector<8x8xbf16>
    %cst_82 = arith.constant dense<0.000000e+00> : vector<32x8xf32>
    %203 = tpu.matmul %200, %202, %cst_82 {dimension_numbers = #tpu.dot_dimension_numbers<[1], [0], [0], [1], [0, 0, 1, 1], [], []>} : vector<32x8xbf16>, vector<8x8xbf16>, vector<32x8xf32> -> vector<32x8xf32>
    %204 = arith.addf %186, %203 : vector<32x8xf32>
    %c31_i32 = arith.constant 31 : i32
    %205 = tpu.dynamic_rotate %130 by %c31_i32 dim 0 : vector<32x8xf32>, i32 -> vector<32x8xf32>
    %c1_i32_83 = arith.constant 1 : i32
    %206 = vector.broadcast %c1_i32_83 : i32 to vector<32x1xi32>
    %207 = arith.addi %147, %206 : vector<32x1xi32>
    %c0_i32_84 = arith.constant 0 : i32
    %208 = vector.broadcast %c0_i32_84 : i32 to vector<32x1xi32>
    %209 = arith.cmpi sge, %207, %208 : vector<32x1xi32>
    %c1_i32_85 = arith.constant 1 : i32
    %210 = vector.broadcast %c1_i32_85 : i32 to vector<32x1xi32>
    %211 = arith.addi %147, %210 : vector<32x1xi32>
    %c16_i32_86 = arith.constant 16 : i32
    %212 = vector.broadcast %c16_i32_86 : i32 to vector<32x1xi32>
    %213 = arith.cmpi slt, %211, %212 : vector<32x1xi32>
    %214 = arith.andi %209, %213 : vector<32x1xi1>
    %cst_87 = arith.constant 0.000000e+00 : f32
    %215 = vector.shape_cast %214 : vector<32x1xi1> to vector<32x1xi1>
    %216 = vector.broadcast %215 : vector<32x1xi1> to vector<32x8xi1>
    %217 = vector.broadcast %cst_87 : f32 to vector<32x8xf32>
    %218 = arith.select %216, %205, %217 : vector<32x8xi1>, vector<32x8xf32>
    %219 = arith.truncf %218 : vector<32x8xf32> to vector<32x8xbf16>
    %c3_88 = arith.constant 3 : index
    %c0_89 = arith.constant 0 : index
    %c0_90 = arith.constant 0 : index
    %220 = vector.load %arg4[%c3_88, %c0_89, %c0_90] : memref<5x8x8xbf16, #tpu.memory_space<vmem>>, vector<1x8x8xbf16>
    %221 = vector.shape_cast %220 : vector<1x8x8xbf16> to vector<8x8xbf16>
    %cst_91 = arith.constant dense<0.000000e+00> : vector<32x8xf32>
    %222 = tpu.matmul %219, %221, %cst_91 {dimension_numbers = #tpu.dot_dimension_numbers<[1], [0], [0], [1], [0, 0, 1, 1], [], []>} : vector<32x8xbf16>, vector<8x8xbf16>, vector<32x8xf32> -> vector<32x8xf32>
    %223 = arith.addf %204, %222 : vector<32x8xf32>
    %c30_i32 = arith.constant 30 : i32
    %224 = tpu.dynamic_rotate %130 by %c30_i32 dim 0 : vector<32x8xf32>, i32 -> vector<32x8xf32>
    %c2_i32_92 = arith.constant 2 : i32
    %225 = vector.broadcast %c2_i32_92 : i32 to vector<32x1xi32>
    %226 = arith.addi %147, %225 : vector<32x1xi32>
    %c0_i32_93 = arith.constant 0 : i32
    %227 = vector.broadcast %c0_i32_93 : i32 to vector<32x1xi32>
    %228 = arith.cmpi sge, %226, %227 : vector<32x1xi32>
    %c2_i32_94 = arith.constant 2 : i32
    %229 = vector.broadcast %c2_i32_94 : i32 to vector<32x1xi32>
    %230 = arith.addi %147, %229 : vector<32x1xi32>
    %c16_i32_95 = arith.constant 16 : i32
    %231 = vector.broadcast %c16_i32_95 : i32 to vector<32x1xi32>
    %232 = arith.cmpi slt, %230, %231 : vector<32x1xi32>
    %233 = arith.andi %228, %232 : vector<32x1xi1>
    %cst_96 = arith.constant 0.000000e+00 : f32
    %234 = vector.shape_cast %233 : vector<32x1xi1> to vector<32x1xi1>
    %235 = vector.broadcast %234 : vector<32x1xi1> to vector<32x8xi1>
    %236 = vector.broadcast %cst_96 : f32 to vector<32x8xf32>
    %237 = arith.select %235, %224, %236 : vector<32x8xi1>, vector<32x8xf32>
    %238 = arith.truncf %237 : vector<32x8xf32> to vector<32x8xbf16>
    %c4_97 = arith.constant 4 : index
    %c0_98 = arith.constant 0 : index
    %c0_99 = arith.constant 0 : index
    %239 = vector.load %arg4[%c4_97, %c0_98, %c0_99] : memref<5x8x8xbf16, #tpu.memory_space<vmem>>, vector<1x8x8xbf16>
    %240 = vector.shape_cast %239 : vector<1x8x8xbf16> to vector<8x8xbf16>
    %cst_100 = arith.constant dense<0.000000e+00> : vector<32x8xf32>
    %241 = tpu.matmul %238, %240, %cst_100 {dimension_numbers = #tpu.dot_dimension_numbers<[1], [0], [0], [1], [0, 0, 1, 1], [], []>} : vector<32x8xbf16>, vector<8x8xbf16>, vector<32x8xf32> -> vector<32x8xf32>
    %242 = arith.addf %223, %241 : vector<32x8xf32>
    %c0_101 = arith.constant 0 : index
    %c0_102 = arith.constant 0 : index
    %243 = vector.load %arg5[%c0_101, %c0_102] : memref<1x8xf32, #tpu.memory_space<vmem>>, vector<1x8xf32>
    %244 = vector.broadcast %243 : vector<1x8xf32> to vector<32x8xf32>
    %245 = arith.addf %242, %244 : vector<32x8xf32>
    %cst_103 = arith.constant 0.000000e+00 : f32
    %246 = vector.broadcast %cst_103 : f32 to vector<32x8xf32>
    %247 = arith.maximumf %245, %246 : vector<32x8xf32>
    %248 = vector.shape_cast %247 : vector<32x8xf32> to vector<8x4x8xf32>
    %249 = vector.extract_strided_slice %248 {offsets = [0, 0, 0], sizes = [8, 1, 8], strides = [1, 1, 1]} : vector<8x4x8xf32> to vector<8x1x8xf32>
    %250 = vector.shape_cast %249 : vector<8x1x8xf32> to vector<8x8xf32>
    %251 = vector.extract_strided_slice %248 {offsets = [0, 1, 0], sizes = [8, 1, 8], strides = [1, 1, 1]} : vector<8x4x8xf32> to vector<8x1x8xf32>
    %252 = vector.shape_cast %251 : vector<8x1x8xf32> to vector<8x8xf32>
    %253 = vector.extract_strided_slice %248 {offsets = [0, 2, 0], sizes = [8, 1, 8], strides = [1, 1, 1]} : vector<8x4x8xf32> to vector<8x1x8xf32>
    %254 = vector.shape_cast %253 : vector<8x1x8xf32> to vector<8x8xf32>
    %255 = vector.extract_strided_slice %248 {offsets = [0, 3, 0], sizes = [8, 1, 8], strides = [1, 1, 1]} : vector<8x4x8xf32> to vector<8x1x8xf32>
    %256 = vector.shape_cast %255 : vector<8x1x8xf32> to vector<8x8xf32>
    %257 = arith.maximumf %250, %252 : vector<8x8xf32>
    %258 = arith.maximumf %254, %256 : vector<8x8xf32>
    %259 = arith.maximumf %257, %258 : vector<8x8xf32>
    %260 = vector.shape_cast %259 : vector<8x8xf32> to vector<2x4x8xf32>
    %261 = vector.extract_strided_slice %260 {offsets = [0, 0, 0], sizes = [2, 1, 8], strides = [1, 1, 1]} : vector<2x4x8xf32> to vector<2x1x8xf32>
    %262 = vector.shape_cast %261 : vector<2x1x8xf32> to vector<2x8xf32>
    %263 = vector.extract_strided_slice %260 {offsets = [0, 1, 0], sizes = [2, 1, 8], strides = [1, 1, 1]} : vector<2x4x8xf32> to vector<2x1x8xf32>
    %264 = vector.shape_cast %263 : vector<2x1x8xf32> to vector<2x8xf32>
    %265 = vector.extract_strided_slice %260 {offsets = [0, 2, 0], sizes = [2, 1, 8], strides = [1, 1, 1]} : vector<2x4x8xf32> to vector<2x1x8xf32>
    %266 = vector.shape_cast %265 : vector<2x1x8xf32> to vector<2x8xf32>
    %267 = vector.extract_strided_slice %260 {offsets = [0, 3, 0], sizes = [2, 1, 8], strides = [1, 1, 1]} : vector<2x4x8xf32> to vector<2x1x8xf32>
    %268 = vector.shape_cast %267 : vector<2x1x8xf32> to vector<2x8xf32>
    %cst_104 = arith.constant 0.000000e+00 : f32
    %269 = vector.broadcast %cst_104 : f32 to vector<2x8xf32>
    %270 = arith.addf %269, %262 : vector<2x8xf32>
    %271 = arith.addf %270, %264 : vector<2x8xf32>
    %272 = arith.addf %271, %266 : vector<2x8xf32>
    %273 = arith.addf %272, %268 : vector<2x8xf32>
    %cst_105 = arith.constant 2.500000e-01 : f32
    %274 = vector.broadcast %cst_105 : f32 to vector<2x8xf32>
    %275 = arith.mulf %273, %274 : vector<2x8xf32>
    %276 = arith.truncf %275 : vector<2x8xf32> to vector<2x8xbf16>
    %c0_106 = arith.constant 0 : index
    %c0_107 = arith.constant 0 : index
    %277 = vector.load %arg6[%c0_106, %c0_107] : memref<8x128xbf16, #tpu.memory_space<vmem>>, vector<8x128xbf16>
    %cst_108 = arith.constant dense<0.000000e+00> : vector<2x128xf32>
    %278 = tpu.matmul %276, %277, %cst_108 {dimension_numbers = #tpu.dot_dimension_numbers<[1], [0], [0], [1], [0, 0, 1, 1], [], []>} : vector<2x8xbf16>, vector<8x128xbf16>, vector<2x128xf32> -> vector<2x128xf32>
    %c0_109 = arith.constant 0 : index
    %c0_110 = arith.constant 0 : index
    %279 = vector.load %arg7[%c0_109, %c0_110] : memref<1x128xf32, #tpu.memory_space<vmem>>, vector<1x128xf32>
    %280 = vector.broadcast %279 : vector<1x128xf32> to vector<2x128xf32>
    %281 = arith.addf %278, %280 : vector<2x128xf32>
    %cst_111 = arith.constant 0.000000e+00 : f32
    %282 = vector.broadcast %cst_111 : f32 to vector<2x128xf32>
    %283 = arith.maximumf %281, %282 : vector<2x128xf32>
    %284 = arith.truncf %283 : vector<2x128xf32> to vector<2x128xbf16>
    %c0_112 = arith.constant 0 : index
    %c0_113 = arith.constant 0 : index
    %285 = vector.load %arg8[%c0_112, %c0_113] : memref<128x128xbf16, #tpu.memory_space<vmem>>, vector<128x128xbf16>
    %cst_114 = arith.constant dense<0.000000e+00> : vector<2x128xf32>
    %286 = tpu.matmul %284, %285, %cst_114 {dimension_numbers = #tpu.dot_dimension_numbers<[1], [0], [0], [1], [0, 0, 1, 1], [], []>} : vector<2x128xbf16>, vector<128x128xbf16>, vector<2x128xf32> -> vector<2x128xf32>
    %c0_115 = arith.constant 0 : index
    %c0_116 = arith.constant 0 : index
    %287 = vector.load %arg9[%c0_115, %c0_116] : memref<1x128xf32, #tpu.memory_space<vmem>>, vector<1x128xf32>
    %288 = vector.broadcast %287 : vector<1x128xf32> to vector<2x128xf32>
    %289 = arith.addf %286, %288 : vector<2x128xf32>
    %c0_117 = arith.constant 0 : index
    %c0_118 = arith.constant 0 : index
    %290 = vector.load %arg10[%c0_117, %c0_118] : memref<2x128xf32, #tpu.memory_space<vmem>>, vector<2x128xf32>
    tpu.vector_store %arg10[%c0_117, %c0_118], %289 {strides = array<i32>} : memref<2x128xf32, #tpu.memory_space<vmem>>, vector<2x128xf32>,
    return
  }
  func.func @transform_0(%arg0: i32) -> (i32, i32, i32) {
    %c0_i32 = arith.constant 0 : i32
    %c0_i32_0 = arith.constant 0 : i32
    %c0_i32_1 = arith.constant 0 : i32
    return %arg0, %c0_i32, %c0_i32_0 : i32, i32, i32
  }
  func.func @transform_1(%arg0: i32) -> (i32, i32, i32) {
    %c0_i32 = arith.constant 0 : i32
    %c0_i32_0 = arith.constant 0 : i32
    %c0_i32_1 = arith.constant 0 : i32
    %c0_i32_2 = arith.constant 0 : i32
    return %c0_i32, %c0_i32_0, %c0_i32_1 : i32, i32, i32
  }
  func.func @transform_2(%arg0: i32) -> (i32, i32) {
    %c0_i32 = arith.constant 0 : i32
    %c0_i32_0 = arith.constant 0 : i32
    %c0_i32_1 = arith.constant 0 : i32
    return %c0_i32, %c0_i32_0 : i32, i32
  }
  func.func @transform_3(%arg0: i32) -> (i32, i32, i32) {
    %c0_i32 = arith.constant 0 : i32
    %c0_i32_0 = arith.constant 0 : i32
    %c0_i32_1 = arith.constant 0 : i32
    %c0_i32_2 = arith.constant 0 : i32
    return %c0_i32, %c0_i32_0, %c0_i32_1 : i32, i32, i32
  }
  func.func @transform_4(%arg0: i32) -> (i32, i32) {
    %c0_i32 = arith.constant 0 : i32
    %c0_i32_0 = arith.constant 0 : i32
    %c0_i32_1 = arith.constant 0 : i32
    return %c0_i32, %c0_i32_0 : i32, i32
  }
  func.func @transform_5(%arg0: i32) -> (i32, i32) {
    %c0_i32 = arith.constant 0 : i32
    %c0_i32_0 = arith.constant 0 : i32
    %c0_i32_1 = arith.constant 0 : i32
    return %c0_i32, %c0_i32_0 : i32, i32
  }
  func.func @transform_6(%arg0: i32) -> (i32, i32) {
    %c0_i32 = arith.constant 0 : i32
    %c0_i32_0 = arith.constant 0 : i32
    %c0_i32_1 = arith.constant 0 : i32
    return %c0_i32, %c0_i32_0 : i32, i32
  }
  func.func @transform_7(%arg0: i32) -> (i32, i32) {
    %c0_i32 = arith.constant 0 : i32
    %c0_i32_0 = arith.constant 0 : i32
    %c0_i32_1 = arith.constant 0 : i32
    return %c0_i32, %c0_i32_0 : i32, i32
  }
  func.func @transform_8(%arg0: i32) -> (i32, i32) {
    %c0_i32 = arith.constant 0 : i32
    %c0_i32_0 = arith.constant 0 : i32
    %c0_i32_1 = arith.constant 0 : i32
    return %c0_i32, %c0_i32_0 : i32, i32
  }
  func.func @transform_9(%arg0: i32) -> (i32, i32) {
    %c0_i32 = arith.constant 0 : i32
    %c0_i32_0 = arith.constant 0 : i32
    return %arg0, %c0_i32 : i32, i32
  }
}

</mosaic_0001>

<bundles_post_ra>
// kernel: vanilla_classifier_forward.1
= control target key start
LH: loop header
LB: loop body
LE: loop exit
PB: predicated region body
PF: predicated region fallthrough
CT: control target
= control target key end

     0   :  { %vm593_vm0 = vcmask 1040384   ;;  %v50_v3 = vlaneseq  ;;  %vm568_vm1 = vcmask 15360   ;;  %s4344_s0 = inlined_call_operand.vmem [shape: f32[2,64,2], index: 0, kind: input, shape index: {}]   ;;  %s4345_s1 = inlined_call_operand.vmem [shape: bf16[5,2,8], index: 1, kind: input, shape index: {}]   ;;  %s4346_s2 = inlined_call_operand.vmem [shape: f32[1,8], index: 2, kind: input, shape index: {}]   ;;  %s4347_s3 = inlined_call_operand.vmem [shape: bf16[5,8,8], index: 3, kind: input, shape index: {}]   ;;  %s4348_s4 = inlined_call_operand.vmem [shape: f32[1,8], index: 4, kind: input, shape index: {}]   ;;  %s4349_s5 = inlined_call_operand.vmem [shape: bf16[8,128], index: 5, kind: input, shape index: {}]   ;;  %s4350_s6 = inlined_call_operand.vmem [shape: f32[1,128], index: 6, kind: input, shape index: {}]   ;;  %s4351_s7 = inlined_call_operand.vmem [shape: bf16[128,128], index: 7, kind: input, shape index: {}]   ;;  %s4352_s8 = inlined_call_operand.vmem [shape: f32[1,128], index: 8, kind: input, shape index: {}]   ;;  %s4353_s9 = inlined_call_operand.hbm [shape: f32[2,128], index: 9, kind: output, shape index: {}]  }
   0x1   :  { %v3067_v0 = vld [vmem:[%s4345_s1 + $0x1] sm:$0x1]  ;;  %v412_v1 = vld [vmem:[%s4345_s1] sm:$0x1]  ;;  %v3549_v6 = vld [vmem:[%s4344_s0 + $0x8] sm:$0xff] }
   0x2   :  { %v3540_v2 = vld [vmem:[%s4344_s0] sm:$0xff]  ;;  %3435 = vmatprep.subr.msk.bf16.mxu0 %vm593_vm0, %v3067_v0  ;;  %v595_v4 = vsel %vm593_vm0, %v3067_v0, 0  ;;  %3436 = vmatprep.subr.msk.bf16.mxu1 %vm593_vm0, %v412_v1  ;;  %v719_v5 = vsel %vm593_vm0, %v412_v1, 0  ;;  %v3554_v7 = vld [vmem:[%s4344_s0 + $0x78] sm:$0xff]  ;;  %v3557_v9 = vshrl.u32 %v50_v3, 7  ;;  %v414_v10 = vrot.slane %v3549_v6, 7 }
   0x3   :  { %v413_v8 = vrot.slane %v3540_v2, 7  ;;  %3290 = vmatpush3.bf16.msra.mxu0 %v595_v4  ;;  %3308 = vmatpush3.bf16.msra.mxu1 %v719_v5  ;;  %v428_v11 = vrot.slane %v3554_v7, 7  ;;  %v259_v12 = vrot.slane %v3540_v2, 6  ;;  %v3084_v13 = vld [vmem:[%s4345_s1 + $0x2] sm:$0x1]  ;;  %v260_v14 = vrot.slane %v3549_v6, 6 }
   0x4   :  { %v274_v15 = vrot.slane %v3554_v7, 6  ;;  %3437 = vmatprep.subr.msk.bf16.mxu0 %vm593_vm0, %v3084_v13  ;;  %v3571_v16 = vld [vmem:[%s4344_s0 + $0x10] sm:$0xff]  ;;  %v3576_v17 = vld [vmem:[%s4344_s0 + $0x18] sm:$0xff]  ;;  %v71_v18 = vand.u32 63, %v3557_v9  ;;  %vm429_vm2 = vcmp.lt.s32.totalorder %v3557_v9, 1  ;;  %vm275_vm3 = vcmp.lt.s32.totalorder %v3557_v9, 2 }
   0x5   :  { %v949_v19 = vsel %vm593_vm0, %v3084_v13, 0  ;;  %v3585_v20 = vld [vmem:[%s4344_s0 + $0x20] sm:$0xff]  ;;  %v3590_v21 = vld [vmem:[%s4344_s0 + $0x28] sm:$0xff]  ;;  %v444_v22 = vsel %vm429_vm2, %v413_v8, %v414_v10  ;;  %v445_v23 = vsel %vm429_vm2, %v428_v11, %v413_v8  ;;  %v290_v24 = vsel %vm275_vm3, %v259_v12, %v260_v14  ;;  %v3617_v36 = vld [vmem:[%s4344_s0 + $0x30] sm:$0xff] }
   0x6   :  { %v291_v25 = vsel %vm275_vm3, %v274_v15, %v259_v12  ;;  %v446_v26 = vadd.s32 4294967295, %v71_v18  ;;  %v292_v27 = vadd.s32 4294967294, %v71_v18  ;;  %v415_v28 = vrot.slane %v3571_v16, 7  ;;  %v3622_v37 = vld [vmem:[%s4345_s1 + $0x3] sm:$0x1]  ;;  %v3629_v42 = vld [vmem:[%s4344_s0 + $0x38] sm:$0xff] }
   0x7   :  { %v416_v29 = vrot.slane %v3576_v17, 7  ;;  %v261_v30 = vrot.slane %v3571_v16, 6  ;;  %v262_v31 = vrot.slane %v3576_v17, 6  ;;  %v417_v32 = vrot.slane %v3585_v20, 7  ;;  %v3634_v43 = vld [vmem:[%s4344_s0 + $0x40] sm:$0xff]  ;;  %3438 = vmatprep.subr.msk.bf16.mxu1 %vm593_vm0, %v3622_v37  ;;  %v3659_v57 = vld [vmem:[%s4344_s0 + $0x48] sm:$0xff] }
   0x8   :  { %v418_v33 = vrot.slane %v3590_v21, 7  ;;  %vm462_vm4 = vcmp.ge.s32.totalorder %v446_v26, 0  ;;  %vm308_vm5 = vcmp.ge.s32.totalorder %v292_v27, 0  ;;  %v443_v35 = vsel %vm429_vm2, %v414_v10, %v415_v28  ;;  %v3645_v48 = vld [vmem:[%s4345_s1 + $0x4] sm:$0x1]  ;;  %v3678_v3 = vld [vmem:[%s4344_s0 + $0x50] sm:$0xff] }
   0x9   :  { %v442_v34 = vsel %vm429_vm2, %v415_v28, %v416_v29  ;;  %v542_v38 = vsel %vm462_vm4, %v445_v23, 0.0  ;;  %v388_v39 = vsel %vm308_vm5, %v291_v25, 0.0  ;;  %v288_v41 = vsel %vm275_vm3, %v261_v30, %v262_v31  ;;  %v3687_v12 = vld [vmem:[%s4344_s0 + $0x58] sm:$0xff] }
   0xa   :  { %v559_v40 = vpack.c.bf16 %v442_v34, %v443_v35  ;;  %v558_v44 = vpack.c.bf16 %v444_v22, %v542_v38  ;;  %v404_v45 = vpack.c.bf16 %v290_v24, %v388_v39  ;;  %v289_v46 = vsel %vm275_vm3, %v260_v14, %v261_v30  ;;  %v3707_v30 = vld [vmem:[%s4344_s0 + $0x60] sm:$0xff] }
   0xb   :  { %v440_v47 = vsel %vm429_vm2, %v417_v32, %v418_v33  ;;  %v405_v49 = vpack.c.bf16 %v288_v41, %v289_v46  ;;  %v441_v50 = vsel %vm429_vm2, %v416_v29, %v417_v32  ;;  %v263_v51 = vrot.slane %v3585_v20, 6 }
   0xc   :  { %v264_v52 = vrot.slane %v3590_v21, 6  ;;  %3291 = vmatprep.mubr.msk.bf16.mxu0 %vm568_vm1, %v558_v44  ;;  %3309 = vmatprep.mubr.msk.bf16.mxu1 %vm568_vm1, %v404_v45  ;;  %v560_v53 = vpack.c.bf16 %v440_v47, %v441_v50  ;;  %v419_v54 = vrot.slane %v3617_v36, 7  ;;  %v420_v55 = vrot.slane %v3629_v42, 7 }
   0xd   :  { %v265_v56 = vrot.slane %v3617_v36, 6  ;;  %3292 = vmatmul.mubr.msk.bf16.vlgmr.msra.gmra.mxu0 %vm568_vm1, %v559_v40  ;;  %3310 = vmatmul.mubr.msk.bf16.vlgmr.msra.gmra.mxu1 %vm568_vm1, %v405_v49  ;;  %v287_v59 = vsel %vm275_vm3, %v262_v31, %v263_v51  ;;  %v266_v60 = vrot.slane %v3629_v42, 6  ;;  %v59_v61 = vadd.s32 64, %v3557_v9 }
   0xe   :  { %v286_v58 = vsel %vm275_vm3, %v263_v51, %v264_v52  ;;  %3326 = vmatpush3.bf16.msra.mxu0 %v949_v19  ;;  %3295 = vmatprep.mubr.msk.bf16.mxu0 %vm568_vm1, %v560_v53  ;;  %v438_v63 = vsel %vm429_vm2, %v419_v54, %v420_v55  ;;  %v439_v0 = vsel %vm429_vm2, %v418_v33, %v419_v54  ;;  %v421_v1 = vrot.slane %v3634_v43, 7 }
   0xf   :  { %v406_v62 = vpack.c.bf16 %v286_v58, %v287_v59  ;;  %v561_v4 = vpack.c.bf16 %v438_v63, %v439_v0  ;;  %v284_v5 = vsel %vm275_vm3, %v265_v56, %v266_v60  ;;  %v285_v8 = vsel %vm275_vm3, %v264_v52, %v265_v56  ;;  %3439 = vmatprep.subr.msk.bf16.mxu0 %vm593_vm0, %v3645_v48 }
  0x10   :  { %v127_v10 = vand.u32 63, %v59_v61  ;;  %v407_v13 = vpack.c.bf16 %v284_v5, %v285_v8  ;;  %v422_v14 = vrot.slane %v3659_v57, 7  ;;  %v437_v18 = vsel %vm429_vm2, %v420_v55, %v421_v1 }
  0x11   :  { %3313 = vmatprep.mubr.msk.bf16.mxu1 %vm568_vm1, %v406_v62  ;;  %v267_v19 = vrot.slane %v3634_v43, 6  ;;  %v268_v23 = vrot.slane %v3659_v57, 6  ;;  %v423_v25 = vrot.slane %v3678_v3, 7  ;;  %v424_v28 = vrot.slane %v3687_v12, 7 }
  0x12   :  { %v454_v22 = vadd.s32 4294967295, %v127_v10  ;;  %v300_v24 = vadd.s32 4294967294, %v127_v10  ;;  %v436_v26 = vsel %vm429_vm2, %v421_v1, %v422_v14  ;;  %v269_v29 = vrot.slane %v3678_v3, 6 }
  0x13   :  { %v283_v27 = vsel %vm275_vm3, %v266_v60, %v267_v19 }
  0x14   :  { %14 = vsyncpa [#allocation3], 0  ;;  %vm470_vm6 = vcmp.ge.s32.totalorder %v454_v22, 0  ;;  %v282_v31 = vsel %vm275_vm3, %v267_v19, %v268_v23  ;;  %vm316_vm7 = vcmp.ge.s32.totalorder %v300_v24, 0  ;;  %v3714_v32 = vld [vmem:[%s4344_s0 + $0x68] sm:$0xff]  ;;  %v435_v35 = vsel %vm429_vm2, %v422_v14, %v423_v25  ;;  %v3733_v50 = vld [vmem:[%s4344_s0 + $0x70] sm:$0xff] }
  0x15   :  { %v550_v33 = vsel %vm470_vm6, %v437_v18, 0.0  ;;  %v396_v34 = vsel %vm316_vm7, %v283_v27, 0.0  ;;  %v270_v38 = vrot.slane %v3687_v12, 6  ;;  %3296 = vmatmul.mubr.msk.bf16.gmra.mxu0 %vm568_vm1, %v561_v4  ;;  %3314 = vmatmul.mubr.msk.bf16.gmra.mxu1 %vm568_vm1, %v407_v13  ;;  %v434_v41 = vsel %vm429_vm2, %v423_v25, %v424_v28  ;;  %s3480_s15 = smov [#allocation2]  }
  0x16   :  { %v562_v39 = vpack.c.bf16 %v436_v26, %v550_v33  ;;  %v408_v40 = vpack.c.bf16 %v282_v31, %v396_v34  ;;  %v425_v44 = vrot.slane %v3707_v30, 7  ;;  %v281_v46 = vsel %vm275_vm3, %v268_v23, %v269_v29  ;;  %s3059_s16 = sshll.u32 %s3480_s15, 4  ;;  %s3060_s16 = int_to_ptr.vmem [resolvable:$true] %s3059_s16 }
  0x17   :  { %v280_v45 = vsel %vm275_vm3, %v269_v29, %v270_v38  ;;  %v426_v47 = vrot.slane %v3714_v32, 7  ;;  %v271_v49 = vrot.slane %v3707_v30, 6  ;;  %v272_v52 = vrot.slane %v3714_v32, 6  ;;  %p3461_p1 = scmp.lt.s32.totalorder %s3060_s16, %s3060_s16 }
  0x18   :  { %3299 = vmatprep.mubr.msk.bf16.mxu0 %vm568_vm1, %v562_v39  ;;  %3317 = vmatprep.mubr.msk.bf16.mxu1 %vm568_vm1, %v408_v40  ;;  %v433_v51 = vsel %vm429_vm2, %v424_v28, %v425_v44  ;;  %v1244_v55 = vsel %vm593_vm0, %v3622_v37, 0  ;;  %v563_v56 = vpack.c.bf16 %v434_v41, %v435_v35  ;;  %v409_v58 = vpack.c.bf16 %v280_v45, %v281_v46 }
  0x19   :  { %v432_v53 = vsel %vm429_vm2, %v425_v44, %v426_v47  ;;  %v279_v54 = vsel %vm275_vm3, %v270_v38, %v271_v49  ;;  %v278_v59 = vsel %vm275_vm3, %v271_v49, %v272_v52  ;;  %v427_v60 = vrot.slane %v3733_v50, 7  ;;  %3344 = vmatpush3.bf16.msra.mxu1 %v1244_v55 }
  0x1a   :  { %v564_v61 = vpack.c.bf16 %v432_v53, %v433_v51  ;;  %v410_v62 = vpack.c.bf16 %v278_v59, %v279_v54  ;;  %v273_v63 = vrot.slane %v3733_v50, 6  ;;  %v1064_v0 = vrot.slane %v3540_v2, 1 }
  0x1b   :  { %v1065_v1 = vrot.slane %v3549_v6, 1  ;;  %v1066_v4 = vrot.slane %v3571_v16, 1  ;;  %vm1080_vm8 = vcmp.lt.s32.totalorder %v3557_v9, 7  ;;  %v430_v37 = vsel %vm429_vm2, %v427_v60, %v428_v11 }
  0x1c   :  { %v431_v5 = vsel %vm429_vm2, %v426_v47, %v427_v60  ;;  %v276_v8 = vsel %vm275_vm3, %v273_v63, %v274_v15  ;;  %v277_v10 = vsel %vm275_vm3, %v272_v52, %v273_v63  ;;  %v3777_v14 = vadd.s32 56, %v3557_v9 }
  0x1d   :  { %3300 = vmatmul.mubr.msk.bf16.gmra.mxu0 %vm568_vm1, %v563_v56  ;;  %3318 = vmatmul.mubr.msk.bf16.gmra.mxu1 %vm568_vm1, %v409_v58  ;;  %v1094_v13 = vsel %vm1080_vm8, %v1065_v1, %v1066_v4  ;;  %v1095_v11 = vsel %vm1080_vm8, %v1064_v0, %v1065_v1  ;;  %v565_v18 = vpack.c.bf16 %v430_v37, %v431_v5  ;;  %v1067_v15 = vrot.slane %v3576_v17, 1 }
  0x1e   :  { %3303 = vmatprep.mubr.msk.bf16.mxu0 %vm568_vm1, %v564_v61  ;;  %3321 = vmatprep.mubr.msk.bf16.mxu1 %vm568_vm1, %v410_v62  ;;  %v411_v19 = vpack.c.bf16 %v276_v8, %v277_v10  ;;  %v914_v22 = vpack.c.bf16 %v3549_v6, %v3540_v2  ;;  %v1209_v23 = vpack.c.bf16 %v1094_v13, %v1095_v11  ;;  %v1068_v24 = vrot.slane %v3585_v20, 1 }
  0x1f   :  { %v1069_v25 = vrot.slane %v3590_v21, 1  ;;  %v1070_v26 = vrot.slane %v3617_v36, 1  ;;  %v120_v27 = vand.u32 63, %v3777_v14  ;;  %v1093_v28 = vsel %vm1080_vm8, %v1066_v4, %v1067_v15 }
  0x20   :  { %v1092_v29 = vsel %vm1080_vm8, %v1067_v15, %v1068_v24  ;;  %v1071_v34 = vrot.slane %v3629_v42, 1  ;;  %v1072_v35 = vrot.slane %v3634_v43, 1  ;;  %v915_v39 = vpack.c.bf16 %v3576_v17, %v3571_v16 }
  0x21   :  { %v1091_v31 = vsel %vm1080_vm8, %v1068_v24, %v1069_v25  ;;  %v1090_v33 = vsel %vm1080_vm8, %v1069_v25, %v1070_v26  ;;  %v1104_v38 = vadd.s32 1, %v120_v27  ;;  %v1210_v40 = vpack.c.bf16 %v1092_v29, %v1093_v28 }
  0x22   :  { %v1539_v41 = vsel %vm593_vm0, %v3645_v48, 0  ;;  %v916_v44 = vpack.c.bf16 %v3590_v21, %v3585_v20  ;;  %v1211_v45 = vpack.c.bf16 %v1090_v33, %v1091_v31  ;;  %v1088_v46 = vsel %vm1080_vm8, %v1071_v34, %v1072_v35 }
  0x23   :  { %vm1136_vm9 = vcmp.lt.s32.totalorder %v1104_v38, 64  ;;  %v1073_v47 = vrot.slane %v3659_v57, 1  ;;  %v1074_v49 = vrot.slane %v3678_v3, 1  ;;  %v1089_v48 = vsel %vm1080_vm8, %v1070_v26, %v1071_v34 }
  0x24   :  { %v1200_v51 = vsel %vm1136_vm9, %v1088_v46, 0.0  ;;  %v3823_v54 = vadd.s32 120, %v3557_v9  ;;  %v917_v55 = vpack.c.bf16 %v3629_v42, %v3617_v36  ;;  %v918_v58 = vpack.c.bf16 %v3659_v57, %v3634_v43 }
  0x25   :  { %3304 = vmatmul.mubr.msk.bf16.gmra.mxu0 %vm568_vm1, %v565_v18  ;;  %3322 = vmatmul.mubr.msk.bf16.gmra.mxu1 %vm568_vm1, %v411_v19  ;;  %v1086_v52 = vsel %vm1080_vm8, %v1073_v47, %v1074_v49  ;;  %v1087_v53 = vsel %vm1080_vm8, %v1072_v35, %v1073_v47  ;;  %v1212_v56 = vpack.c.bf16 %v1200_v51, %v1089_v48  ;;  %v1075_v60 = vrot.slane %v3687_v12, 1 }
  0x26   :  { %3327 = vmatprep.mubr.msk.bf16.mxu0 %vm568_vm1, %v914_v22  ;;  %3345 = vmatprep.mubr.msk.bf16.mxu1 %vm568_vm1, %v1209_v23  ;;  %v1213_v59 = vpack.c.bf16 %v1086_v52, %v1087_v53  ;;  %v1076_v61 = vrot.slane %v3707_v30, 1  ;;  %v1077_v62 = vrot.slane %v3714_v32, 1  ;;  %v1078_v63 = vrot.slane %v3733_v50, 1 }
  0x27   :  { %v176_v1 = vand.u32 63, %v3823_v54  ;;  %v1085_v37 = vsel %vm1080_vm8, %v1074_v49, %v1075_v60  ;;  %v1079_v10 = vrot.slane %v3554_v7, 1  ;;  %v919_v11 = vpack.c.bf16 %v3687_v12, %v3678_v3 }
  0x28   :  { %v1084_v4 = vsel %vm1080_vm8, %v1075_v60, %v1076_v61  ;;  %v1082_v5 = vsel %vm1080_vm8, %v1077_v62, %v1078_v63  ;;  %v1083_v8 = vsel %vm1080_vm8, %v1076_v61, %v1077_v62  ;;  %v920_v19 = vpack.c.bf16 %v3714_v32, %v3707_v30 }
  0x29   :  { %v1112_v13 = vadd.s32 1, %v176_v1  ;;  %v1214_v18 = vpack.c.bf16 %v1084_v4, %v1085_v37  ;;  %v1215_v22 = vpack.c.bf16 %v1082_v5, %v1083_v8  ;;  %v1359_v15 = vrot.slane %v3540_v2, 2  ;;  %v3176_v5 = vld [vmem:[%s4347_s3 + $0x4] sm:$0xf] }
  0x2a   :  { %v1096_v23 = vsel %vm1080_vm8, %v1079_v10, %v1064_v0  ;;  %v1360_v24 = vrot.slane %v3549_v6, 2  ;;  %v1361_v25 = vrot.slane %v3571_v16, 2  ;;  %vm1375_vm11 = vcmp.lt.s32.totalorder %v3557_v9, 6 }
  0x2b   :  { %vm1144_vm10 = vcmp.lt.s32.totalorder %v1112_v13, 64  ;;  %v1081_v2 = vsel %vm1080_vm8, %v1078_v63, %v1079_v10  ;;  %v921_v16 = vpack.c.bf16 %v3554_v7, %v3733_v50  ;;  %v1362_v29 = vrot.slane %v3576_v17, 2 }
  0x2c   :  { %v1208_v26 = vsel %vm1144_vm10, %v1096_v23, 0.0  ;;  %v1389_v0 = vsel %vm1375_vm11, %v1360_v24, %v1361_v25  ;;  %v1390_v6 = vsel %vm1375_vm11, %v1359_v15, %v1360_v24  ;;  %v1363_v33 = vrot.slane %v3585_v20, 2 }
  0x2d   :  { %3328 = vmatmul.mubr.msk.bf16.vlgmr.msra.gmra.mxu0 %vm568_vm1, %v915_v39  ;;  %3346 = vmatmul.mubr.msk.bf16.vlgmr.msra.gmra.mxu1 %vm568_vm1, %v1210_v40  ;;  %v1216_v28 = vpack.c.bf16 %v1208_v26, %v1081_v2  ;;  %v1504_v31 = vpack.c.bf16 %v1389_v0, %v1390_v6  ;;  %v1364_v34 = vrot.slane %v3590_v21, 2  ;;  %v1365_v35 = vrot.slane %v3617_v36, 2 }
  0x2e   :  { %3362 = vmatpush3.bf16.msra.mxu0 %v1539_v41  ;;  %3331 = vmatprep.mubr.msk.bf16.mxu0 %vm568_vm1, %v916_v44  ;;  %v1388_v38 = vsel %vm1375_vm11, %v1361_v25, %v1362_v29  ;;  %v1387_v39 = vsel %vm1375_vm11, %v1362_v29, %v1363_v33  ;;  %v1366_v21 = vrot.slane %v3629_v42, 2  ;;  %v1367_v36 = vrot.slane %v3634_v43, 2 }
  0x2f   :  { %3349 = vmatprep.mubr.msk.bf16.mxu1 %vm568_vm1, %v1211_v45  ;;  %v1385_v17 = vsel %vm1375_vm11, %v1364_v34, %v1365_v35  ;;  %v1386_v20 = vsel %vm1375_vm11, %v1363_v33, %v1364_v34  ;;  %v1399_v40 = vadd.s32 2, %v120_v27  ;;  %v1505_v41 = vpack.c.bf16 %v1387_v39, %v1388_v38  ;;  %v3946_v33 = vld [vmem:[%s4347_s3] sm:$0xf] }
  0x30   :  { %v1506_v44 = vpack.c.bf16 %v1385_v17, %v1386_v20  ;;  %v1383_v45 = vsel %vm1375_vm11, %v1366_v21, %v1367_v36  ;;  %v1368_v46 = vrot.slane %v3659_v57, 2  ;;  %v1369_v47 = vrot.slane %v3678_v3, 2  ;;  %4356 = vst [vmem:[#allocation5_spill] sm:$0xff] %v3946_v33 }
  0x31   :  { %vm1431_vm12 = vcmp.lt.s32.totalorder %v1399_v40, 64  ;;  %v1384_v42 = vsel %vm1375_vm11, %v1365_v35, %v1366_v21  ;;  %v1370_v57 = vrot.slane %v3687_v12, 2  ;;  %v1371_v3 = vrot.slane %v3707_v30, 2 }
  0x32   :  { %v1495_v43 = vsel %vm1431_vm12, %v1383_v45, 0.0  ;;  %v1381_v14 = vsel %vm1375_vm11, %v1368_v46, %v1369_v47  ;;  %v1382_v27 = vsel %vm1375_vm11, %v1367_v36, %v1368_v46  ;;  %v1372_v51 = vrot.slane %v3714_v32, 2 }
  0x33   :  { %v1507_v49 = vpack.c.bf16 %v1495_v43, %v1384_v42  ;;  %v1508_v48 = vpack.c.bf16 %v1381_v14, %v1382_v27  ;;  %v1373_v52 = vrot.slane %v3733_v50, 2  ;;  %v1379_v53 = vsel %vm1375_vm11, %v1370_v57, %v1371_v3 }
  0x34   :  { %v1378_v12 = vsel %vm1375_vm11, %v1371_v3, %v1372_v51  ;;  %v1374_v30 = vrot.slane %v3554_v7, 2  ;;  %v1407_v32 = vadd.s32 2, %v176_v1  ;;  %vm2362_vm14 = vcmask 1043456  }
  0x35   :  { %3332 = vmatmul.mubr.msk.bf16.gmra.mxu0 %vm568_vm1, %v917_v55  ;;  %3350 = vmatmul.mubr.msk.bf16.gmra.mxu1 %vm568_vm1, %v1212_v56  ;;  %v1380_v55 = vsel %vm1375_vm11, %v1369_v47, %v1370_v57  ;;  %v1377_v56 = vsel %vm1375_vm11, %v1372_v51, %v1373_v52  ;;  %v2364_v13 = vsel %vm2362_vm14, %v3176_v5, 0  ;;  %vm2237_vm15 = vcmask 1041409  }
  0x36   :  { %3335 = vmatprep.mubr.msk.bf16.mxu0 %vm568_vm1, %v918_v58  ;;  %3353 = vmatprep.mubr.msk.bf16.mxu1 %vm568_vm1, %v1213_v59  ;;  %v1509_v50 = vpack.c.bf16 %v1379_v53, %v1380_v55  ;;  %v1510_v58 = vpack.c.bf16 %v1377_v56, %v1378_v12  ;;  %v1391_v59 = vsel %vm1375_vm11, %v1374_v30, %v1359_v15  ;;  %vm1439_vm13 = vcmp.lt.s32.totalorder %v1407_v32, 64 }
  0x37   :  { %v1376_v60 = vsel %vm1375_vm11, %v1373_v52, %v1374_v30  ;;  %v1503_v61 = vsel %vm1439_vm13, %v1391_v59, 0.0  ;;  %3440 = vmatprep.subr.msk.bf16.mxu1 %vm2362_vm14, %v3176_v5  ;;  %v53_v12 = vadd.s32 16, %v3557_v9  ;;  %v52_v32 = vadd.s32 8, %v3557_v9 }
  0x38   :  { %v1511_v62 = vpack.c.bf16 %v1503_v61, %v1376_v60  ;;  %3380 = vmatpush3.bf16.msra.mxu1 %v2364_v13  ;;  %v3980_v61 = vsub.s32 0, %v3557_v9  ;;  %vm2239_vm0 = vcmask 1042434   ;;  %vm2243_vm4 = vcmask 1044484  }
  0x39   :  { %3441 = vmatprep.subr.msk.bf16.mxu1 %vm2362_vm14, %v3946_v33  ;;  %v2047_v60 = vand.u32 15, %v53_v12  ;;  %vm2245_vm5 = vcmask 1045509   ;;  %vm2247_vm6 = vcmask 1046534   ;;  %vm2249_vm7 = vcmask 1047559  }
  0x3a   :  { %4364 = vst [vmem:[#allocation13_spill] sm:$0xff] %v3980_v61 }
  0x3d   :  { %3336 = vmatmul.mubr.msk.bf16.gmra.mxu0 %vm568_vm1, %v919_v11  ;;  %3354 = vmatmul.mubr.msk.bf16.gmra.mxu1 %vm568_vm1, %v1214_v18 }
  0x3e   :  { %3339 = vmatprep.mubr.msk.bf16.mxu0 %vm568_vm1, %v920_v19  ;;  %3357 = vmatprep.mubr.msk.bf16.mxu1 %vm568_vm1, %v1215_v22 }
  0x45   :  { %3340 = vmatmul.mubr.msk.bf16.gmra.mxu0 %vm568_vm1, %v921_v16  ;;  %3358 = vmatmul.mubr.msk.bf16.gmra.mxu1 %vm568_vm1, %v1216_v28 }
  0x46   :  { %3363 = vmatprep.mubr.msk.bf16.mxu0 %vm568_vm1, %v1504_v31 }
  0x4d   :  { %3364 = vmatmul.mubr.msk.bf16.vlgmr.msra.gmra.mxu0 %vm568_vm1, %v1505_v41 }
  0x4e   :  { %3367 = vmatprep.mubr.msk.bf16.mxu0 %vm568_vm1, %v1506_v44 }
  0x55   :  { %3368 = vmatmul.mubr.msk.bf16.gmra.mxu0 %vm568_vm1, %v1507_v49 }
  0x56   :  { %3371 = vmatprep.mubr.msk.bf16.mxu0 %vm568_vm1, %v1508_v48 }
  0x5d   :  { %3372 = vmatmul.mubr.msk.bf16.gmra.mxu0 %vm568_vm1, %v1509_v50 }
  0x5e   :  { %3375 = vmatprep.mubr.msk.bf16.mxu0 %vm568_vm1, %v1510_v58 }
  0x65   :  { %3376 = vmatmul.mubr.msk.bf16.gmra.mxu0 %vm568_vm1, %v1511_v62  ;;  %vm2241_vm1 = vcmask 1043459  }
  0xcd   :  { %v3928_v7 = vpop.f32.mrf.mxu0  ;;  %v3311_v54 = vpop.f32.mrf.mxu1 }
  0xce   :  { %v764_v59 = vadd.f32 %v3311_v54, %v3928_v7  ;;  %v2033_v54 = vand.u32 15, %v3557_v9 }
  0xcf   :  { %v3930_v63 = vpop.f32.mrf.mxu0  ;;  %v3932_v1 = vpop.f32.mrf.mxu1 }
  0xd0   :  { %v756_v62 = vadd.f32 %v3932_v1, %v3930_v63  ;;  %v3994_v63 = vadd.s32 24, %v3557_v9 }
  0xd1   :  { %v3934_v4 = vpop.f32.mrf.mxu0  ;;  %v3936_v37 = vpop.f32.mrf.mxu1 }
  0xd2   :  { %v767_v13 = vadd.f32 %v3936_v37, %v3934_v4 }
  0xd3   :  { %v634_v8 = vpop.f32.mrf.mxu0  ;;  %v758_v10 = vpop.f32.mrf.mxu1 }
  0xd4   :  { %v759_v33 = vadd.f32 %v758_v10, %v634_v8  ;;  %v3998_v10 = vadd.s32 4294967294, %v2047_v60 }
  0xd5   :  { %v3297_v11 = vpop.f32.mrf.mxu0  ;;  %v3315_v18 = vpop.f32.mrf.mxu1 }
  0xd7   :  { %v647_v19 = vpop.f32.mrf.mxu0  ;;  %v771_v22 = vpop.f32.mrf.mxu1 }
  0xd9   :  { %v3298_v15 = vpop.f32.mrf.mxu0  ;;  %v3316_v23 = vpop.f32.mrf.mxu1 }
  0xdb   :  { %v650_v24 = vpop.f32.mrf.mxu0  ;;  %v774_v25 = vpop.f32.mrf.mxu1 }
  0xdc   :  { %v775_v12 = vadd.f32 %v774_v25, %v650_v24 }
  0xdd   :  { %v3301_v2 = vpop.f32.mrf.mxu0  ;;  %v3319_v26 = vpop.f32.mrf.mxu1 }
  0xde   :  { %v796_v1 = vadd.f32 %v3319_v26, %v3301_v2  ;;  %v4005_v2 = vld [vmem:[%s4346_s2] ss:$0 sm:$0xff] }
  0xdf   :  { %v663_v0 = vpop.f32.mrf.mxu0  ;;  %v787_v6 = vpop.f32.mrf.mxu1 }
  0xe0   :  { %v788_v4 = vadd.f32 %v787_v6, %v663_v0 }
  0xe1   :  { %v3302_v16 = vpop.f32.mrf.mxu0  ;;  %v3320_v28 = vpop.f32.mrf.mxu1 }
  0xe2   :  { %v799_v37 = vadd.f32 %v3320_v28, %v3302_v16  ;;  %v2054_v28 = vand.u32 15, %v3994_v63 }
  0xe3   :  { %v666_v29 = vpop.f32.mrf.mxu0  ;;  %v790_v31 = vpop.f32.mrf.mxu1 }
  0xe5   :  { %v3305_v34 = vpop.f32.mrf.mxu0  ;;  %v3323_v35 = vpop.f32.mrf.mxu1 }
  0xe7   :  { %v679_v38 = vpop.f32.mrf.mxu0  ;;  %v803_v39 = vpop.f32.mrf.mxu1 }
  0xe9   :  { %v3950_v17 = vpop.f32.mrf.mxu0  ;;  %v3952_v20 = vpop.f32.mrf.mxu1 }
  0xeb   :  { %v3954_v21 = vpop.f32.mrf.mxu0  ;;  %v3956_v36 = vpop.f32.mrf.mxu1 }
  0xed   :  { %v3329_v40 = vpop.f32.mrf.mxu0  ;;  %v3347_v41 = vpop.f32.mrf.mxu1 }
  0xef   :  { %v985_v44 = vpop.f32.mrf.mxu0  ;;  %v1280_v45 = vpop.f32.mrf.mxu1 }
  0xf0   :  { %v1048_v61 = vadd.f32 %v985_v44, %v756_v62 }
  0xf1   :  { %v3330_v46 = vpop.f32.mrf.mxu0  ;;  %v3958_v47 = vpop.f32.mrf.mxu1 }
  0xf2   :  { %v1343_v0 = vadd.f32 %v1280_v45, %v1048_v61  ;;  %v4016_v45 = vadd.f32 %v3956_v36, %v3954_v21 }
  0xf3   :  { %v988_v42 = vpop.f32.mrf.mxu0  ;;  %v3960_v43 = vpop.f32.mrf.mxu1 }
  0xf4   :  { %v1049_v24 = vadd.f32 %v988_v42, %v759_v33  ;;  %v815_v33 = vadd.f32 %v3952_v20, %v3950_v17 }
  0xf5   :  { %v3333_v14 = vpop.f32.mrf.mxu0  ;;  %v3962_v27 = vpop.f32.mrf.mxu1 }
  0xf6   :  { %4357 = vst [vmem:[#allocation6_spill] sm:$0xff] %v3962_v27  ;;  %v3991_v27 = vadd.s32 4294967295, %v2047_v60 }
  0xf7   :  { %v1001_v49 = vpop.f32.mrf.mxu0  ;;  %v3964_v57 = vpop.f32.mrf.mxu1 }
  0xf8   :  { %4358 = vst [vmem:[#allocation7_spill] sm:$0xff] %v3964_v57  ;;  %vm2329_vm13 = vcmp.ge.s32.totalorder %v3991_v27, 0 }
  0xf9   :  { %v3334_v48 = vpop.f32.mrf.mxu0  ;;  %v3966_v51 = vpop.f32.mrf.mxu1 }
  0xfa   :  { %4359 = vst [vmem:[#allocation8_spill] sm:$0xff] %v3966_v51  ;;  %v772_v51 = vadd.f32 %v771_v22, %v647_v19  ;;  %v1051_v19 = vadd.f32 %v3330_v46, %v767_v13  ;;  %v1344_v46 = vadd.f32 %v3960_v43, %v1049_v24 }
  0xfb   :  { %v1004_v3 = vpop.f32.mrf.mxu0  ;;  %v3968_v55 = vpop.f32.mrf.mxu1 }
  0xfc   :  { %4360 = vst [vmem:[#allocation9_spill] sm:$0xff] %v3968_v55  ;;  %v2040_v55 = vand.u32 15, %v52_v32 }
  0xfd   :  { %v3337_v52 = vpop.f32.mrf.mxu0  ;;  %v3974_v50 = vpop.f32.mrf.mxu1 }
  0xfe   :  { %4362 = vst [vmem:[#allocation11_spill] sm:$0xff] %v3974_v50  ;;  %v780_v50 = vadd.f32 %v3315_v18, %v3297_v11  ;;  %v791_v11 = vadd.f32 %v790_v31, %v666_v29  ;;  %v4000_v22 = vadd.s32 1, %v2040_v55  ;;  %v4007_v26 = vadd.s32 2, %v2040_v55 }
  0xff   :  { %v1017_v53 = vpop.f32.mrf.mxu0  ;;  %v1312_v57 = vpop.f32.mrf.mxu1  ;;  %v1052_v29 = vadd.f32 %v1001_v49, %v772_v51 }
 0x100   :  { %v1054_v6 = vadd.f32 %v3333_v14, %v780_v50  ;;  %v1056_v42 = vadd.f32 %v1017_v53, %v788_v4  ;;  %vm2580_vm9 = vcmp.lt.s32.totalorder %v4000_v22, 16  ;;  %vm2682_vm10 = vcmp.lt.s32.totalorder %v4007_v26, 16 }
 0x101   :  { %v3338_v56 = vpop.f32.mrf.mxu0  ;;  %v3356_v25 = vpop.f32.mrf.mxu1  ;;  %v2284_v26 = vadd.s32 4294967294, %v2033_v54 }
 0x102   :  { %v1059_v14 = vadd.f32 %v3338_v56, %v799_v37  ;;  %v4034_v61 = vadd.f32 %v1312_v57, %v1056_v42 }
 0x103   :  { %v3971_v30 = vpop.f32.mrf.mxu0  ;;  %v1315_v49 = vpop.f32.mrf.mxu1  ;;  %v4368_v21 = vld [vmem:[#allocation9_spill] sm:$0xff] }
 0x104   :  { %4361 = vst [vmem:[#allocation10_spill] sm:$0xff] %v3971_v30  ;;  %v1050_v30 = vadd.f32 %v3329_v40, %v764_v59 }
 0x105   :  { %v3976_v58 = vpop.f32.mrf.mxu0  ;;  %v4369_v43 = vld [vmem:[#allocation11_spill] sm:$0xff] }
 0x106   :  { %4363 = vst [vmem:[#allocation12_spill] sm:$0xff] %v3976_v58  ;;  %v783_v58 = vadd.f32 %v3316_v23, %v3298_v15  ;;  %v1345_v18 = vadd.f32 %v3347_v41, %v1050_v30  ;;  %v812_v15 = vadd.f32 %v3323_v35, %v3305_v34  ;;  %v804_v23 = vadd.f32 %v803_v39, %v679_v38  ;;  %v4367_v30 = vld [vmem:[#allocation8_spill] sm:$0xff] }
 0x107   :  { %v3984_v5 = vpop.f32.mrf.mxu0  ;;  %v1053_v41 = vadd.f32 %v1004_v3, %v775_v12  ;;  %v1058_v34 = vadd.f32 %v3337_v52, %v796_v1  ;;  %v1346_v38 = vadd.f32 %v3958_v47, %v1051_v19  ;;  %v4365_v3 = vld [vmem:[#allocation6_spill] sm:$0xff]  ;;  %v4366_v47 = vld [vmem:[#allocation7_spill] sm:$0xff]  ;;  %v4037_v12 = vadd.f32 %v3356_v25, %v1059_v14  ;;  %v3359_v1 = vpop.f32.mrf.mxu1 }
 0x108   :  { %v1055_v31 = vadd.f32 %v3334_v48, %v783_v58  ;;  %v1349_v51 = vadd.f32 %v4365_v3, %v1054_v6  ;;  %v4022_v55 = vadd.f32 %v4366_v47, %v1052_v29 }
 0x109   :  { %v3988_v7 = vpop.f32.mrf.mxu0  ;;  %v4028_v36 = vadd.f32 %v4368_v21, %v1053_v41  ;;  %v4031_v53 = vadd.f32 %v4369_v43, %v1058_v34  ;;  %v1060_v41 = vadd.f32 %v3984_v5, %v804_v23 }
 0x10a   :  { %v4025_v32 = vadd.f32 %v4367_v30, %v1055_v31 }
 0x10b   :  { %v3996_v8 = vpop.f32.mrf.mxu0  ;;  %v4370_v62 = vld [vmem:[#allocation10_spill] sm:$0xff] }
 0x10c   :  { %v1057_v13 = vadd.f32 %v4370_v62, %v791_v11 }
 0x10d   :  { %v3365_v40 = vpop.f32.mrf.mxu0 }
 0x10e   :  { %v1640_v16 = vadd.f32 %v3365_v40, %v1345_v18 }
 0x10f   :  { %v1575_v35 = vpop.f32.mrf.mxu0 }
 0x110   :  { %v1663_v39 = vadd.f32 %v4005_v2, %v1640_v16  ;;  %v1638_v44 = vadd.f32 %v1575_v35, %v1343_v0  ;;  %v4371_v0 = vld [vmem:[#allocation12_spill] sm:$0xff]  ;;  %v4042_v35 = vadd.f32 %v1315_v49, %v1057_v13 }
 0x111   :  { %v3366_v48 = vpop.f32.mrf.mxu0  ;;  %v1062_v6 = vadd.f32 %v4371_v0, %v812_v15 }
 0x112   :  { %v1679_v52 = vmax.f32 %v1663_v39, 0.0  ;;  %v1661_v17 = vadd.f32 %v4005_v2, %v1638_v44  ;;  %v1641_v20 = vadd.f32 %v3366_v48, %v1346_v38  ;;  %v1328_v38 = vpop.f32.mrf.mxu1 }
 0x113   :  { %v1578_v56 = vpop.f32.mrf.mxu0  ;;  %v4048_v49 = vadd.f32 %v1328_v38, %v1060_v41 }
 0x114   :  { %v1711_v50 = vcombine.high %v1679_v52, %v1679_v52  ;;  %v3116_v58 = vrot.slane %v1679_v52, 9  ;;  %v1677_v59 = vmax.f32 %v1661_v17, 0.0  ;;  %v1664_v60 = vadd.f32 %v4005_v2, %v1641_v20 }
 0x115   :  { %v1639_v4 = vadd.f32 %v1578_v56, %v1344_v46  ;;  %v3369_v37 = vpop.f32.mrf.mxu0  ;;  %v1063_v17 = vadd.f32 %v3988_v7, %v815_v33  ;;  %v4372_v33 = vld [vmem:[#allocation13_spill] sm:$0xff] }
 0x116   :  { %v3117_v18 = vrot.slane %v1711_v50, 9  ;;  %v1841_v19 = vmax.f32 %v1679_v52, %v3116_v58  ;;  %v1709_v24 = vcombine.high %v1677_v59, %v1677_v59  ;;  %v3112_v40 = vrot.slane %v1677_v59, 9 }
 0x117   :  { %v1680_v16 = vmax.f32 %v1664_v60, 0.0  ;;  %v1662_v29 = vadd.f32 %v4005_v2, %v1639_v4  ;;  %v1644_v31 = vadd.f32 %v3369_v37, %v1349_v51  ;;  %v1591_v57 = vpop.f32.mrf.mxu0  ;;  %v4045_v51 = vadd.f32 %v3359_v1, %v1062_v6 }
 0x118   :  { %v1842_v11 = vmax.f32 %v1711_v50, %v3117_v18  ;;  %v3113_v25 = vrot.slane %v1709_v24, 9  ;;  %v1837_v34 = vmax.f32 %v1677_v59, %v3112_v40  ;;  %v3148_v39 = vrot.slane %v1841_v19, 10 }
 0x119   :  { %v1712_v44 = vcombine.high %v1680_v16, %v1680_v16  ;;  %v1678_v46 = vmax.f32 %v1662_v29, 0.0  ;;  %v3370_v42 = vpop.f32.mrf.mxu0  ;;  %v3118_v48 = vrot.slane %v1680_v16, 9  ;;  %v1667_v3 = vadd.f32 %v4005_v2, %v1644_v31 }
 0x11a   :  { %v1838_v14 = vmax.f32 %v1709_v24, %v3113_v25  ;;  %v3144_v15 = vrot.slane %v1837_v34, 10  ;;  %v3149_v52 = vrot.slane %v1842_v11, 10  ;;  %v2001_v30 = vmax.f32 %v1841_v19, %v3148_v39 }
 0x11b   :  { %v1710_v5 = vcombine.high %v1678_v46, %v1678_v46  ;;  %v3114_v23 = vrot.slane %v1678_v46, 9  ;;  %v3119_v21 = vrot.slane %v1712_v44, 9  ;;  %v1594_v50 = vpop.f32.mrf.mxu0  ;;  %v4052_v58 = vadd.f32 %v3996_v8, %v4016_v45 }
 0x11c   :  { %v3145_v20 = vrot.slane %v1838_v14, 10  ;;  %v1997_v47 = vmax.f32 %v1837_v34, %v3144_v15  ;;  %v1843_v60 = vmax.f32 %v1680_v16, %v3118_v48  ;;  %v1683_v62 = vmax.f32 %v1667_v3, 0.0 }
 0x11d   :  { %v3115_v43 = vrot.slane %v1710_v5, 9  ;;  %v1839_v56 = vmax.f32 %v1678_v46, %v3114_v23  ;;  %v2002_v7 = vmax.f32 %v1842_v11, %v3149_v52  ;;  %v1642_v24 = vadd.f32 %v1591_v57, %v4022_v55  ;;  %v3373_v6 = vpop.f32.mrf.mxu0  ;;  %v3360_v46 = vpop.f32.mrf.mxu1 }
 0x11e   :  { %v1998_v59 = vmax.f32 %v1838_v14, %v3145_v20  ;;  %v2112_v13 = vrot.slane %v1997_v47, %v4372_v33  ;;  %v1715_v18 = vcombine.high %v1683_v62, %v1683_v62  ;;  %v3124_v19 = vrot.slane %v1683_v62, 9 }
 0x11f   :  { %v1840_v1 = vmax.f32 %v1710_v5, %v3115_v43  ;;  %v3146_v4 = vrot.slane %v1839_v56, 10  ;;  %v2128_v40 = vrot.slane %v2001_v30, %v4372_v33  ;;  %v1844_v0 = vmax.f32 %v1712_v44, %v3119_v21  ;;  %v1607_v52 = vpop.f32.mrf.mxu0 }
 0x120   :  { %v2116_v37 = vrot.slane %v1998_v59, %v4372_v33  ;;  %v3125_v29 = vrot.slane %v1715_v18, 9  ;;  %v1849_v31 = vmax.f32 %v1683_v62, %v3124_v19  ;;  %v1665_v41 = vadd.f32 %v4005_v2, %v1642_v24 }
 0x121   :  { %v3147_v8 = vrot.slane %v1840_v1, 10  ;;  %v1999_v45 = vmax.f32 %v1839_v56, %v3146_v4  ;;  %v3150_v11 = vrot.slane %v1843_v60, 10  ;;  %v1645_v38 = vadd.f32 %v3370_v42, %v4025_v32 }
 0x122   :  { %v2238_v16 = vsel %vm2237_vm15, %v2116_v37, %v2112_v13  ;;  %v2132_v55 = vrot.slane %v2002_v7, %v4372_v33  ;;  %v1850_v57 = vmax.f32 %v1715_v18, %v3125_v29  ;;  %v1681_v39 = vmax.f32 %v1665_v41, 0.0  ;;  %v3374_v13 = vpop.f32.mrf.mxu0 }
 0x123   :  { %v2000_v25 = vmax.f32 %v1840_v1, %v3147_v8  ;;  %v2120_v34 = vrot.slane %v1999_v45, %v4372_v33  ;;  %v1643_v44 = vadd.f32 %v1594_v50, %v4028_v36  ;;  %v1668_v48 = vadd.f32 %v4005_v2, %v1645_v38 }
 0x124   :  { %v1648_v3 = vadd.f32 %v3373_v6, %v4031_v53  ;;  %v3151_v5 = vrot.slane %v1844_v0, 10  ;;  %v3156_v23 = vrot.slane %v1849_v31, 10  ;;  %v1713_v20 = vcombine.high %v1681_v39, %v1681_v39 }
 0x125   :  { %v2124_v14 = vrot.slane %v2000_v25, %v4372_v33  ;;  %v2240_v15 = vsel %vm2239_vm0, %v2120_v34, %v2238_v16  ;;  %v3120_v32 = vrot.slane %v1681_v39, 9  ;;  %v1684_v47 = vmax.f32 %v1668_v48, 0.0 }
 0x126   :  { %v1666_v30 = vadd.f32 %v4005_v2, %v1643_v44  ;;  %v1671_v36 = vadd.f32 %v4005_v2, %v1648_v3  ;;  %v4071_v21 = vadd.f32 %v3360_v46, %v1063_v17  ;;  %v3157_v56 = vrot.slane %v1850_v57, 10 }
 0x127   :  { %v2242_v42 = vsel %vm2241_vm1, %v2124_v14, %v2240_v15  ;;  %v3121_v50 = vrot.slane %v1713_v20, 9  ;;  %v1845_v59 = vmax.f32 %v1681_v39, %v3120_v32  ;;  %v1716_v62 = vcombine.high %v1684_v47, %v1684_v47 }
 0x128   :  { %v2244_v43 = vsel %vm2243_vm4, %v2128_v40, %v2242_v42  ;;  %v3126_v7 = vrot.slane %v1684_v47, 9  ;;  %v4077_v1 = vmax.f32 %v1843_v60, %v3150_v11  ;;  %v1682_v37 = vmax.f32 %v1666_v30, 0.0  ;;  %v1331_v40 = vpop.f32.mrf.mxu1  ;;  %v1610_v60 = vpop.f32.mrf.mxu0 }
 0x129   :  { %v4075_v53 = vsel %vm2245_vm5, %v2132_v55, %v2244_v43  ;;  %v1846_v4 = vmax.f32 %v1713_v20, %v3121_v50  ;;  %v1687_v18 = vmax.f32 %v1671_v36, 0.0  ;;  %v4079_v19 = vmax.f32 %v1844_v0, %v3151_v5 }
 0x12a   :  { %v2009_v17 = vmax.f32 %v1849_v31, %v3156_v23  ;;  %v3152_v24 = vrot.slane %v1845_v59, 10  ;;  %v3127_v8 = vrot.slane %v1716_v62, 9  ;;  %v1714_v6 = vcombine.high %v1682_v37, %v1682_v37  ;;  %v3377_v23 = vpop.f32.mrf.mxu0 }
 0x12b   :  { %v3153_v45 = vrot.slane %v1846_v4, 10  ;;  %v3122_v16 = vrot.slane %v1682_v37, 9  ;;  %v1719_v29 = vcombine.high %v1687_v18, %v1687_v18  ;;  %v2010_v41 = vmax.f32 %v1850_v57, %v3157_v56 }
 0x12c   :  { %v2005_v25 = vmax.f32 %v1845_v59, %v3152_v24  ;;  %v1851_v34 = vmax.f32 %v1684_v47, %v3126_v7  ;;  %v1646_v38 = vadd.f32 %v1607_v52, %v4034_v61  ;;  %v3123_v55 = vrot.slane %v1714_v6, 9 }
 0x12d   :  { %v2006_v11 = vmax.f32 %v1846_v4, %v3153_v45  ;;  %v1847_v39 = vmax.f32 %v1682_v37, %v3122_v16  ;;  %v3132_v44 = vrot.slane %v1687_v18, 9  ;;  %v4083_v0 = vadd.f32 %v1331_v40, %v4052_v58 }
 0x12e   :  { %v2136_v31 = vrot.slane %v4077_v1, %v4372_v33  ;;  %v2140_v46 = vrot.slane %v4079_v19, %v4372_v33  ;;  %v4089_v14 = vmax.f32 %v1716_v62, %v3127_v8  ;;  %v1848_v15 = vmax.f32 %v1714_v6, %v3123_v55 }
 0x12f   :  { %v2148_v57 = vrot.slane %v2006_v11, %v4372_v33  ;;  %v3154_v61 = vrot.slane %v1847_v39, 10  ;;  %v3133_v48 = vrot.slane %v1719_v29, 9  ;;  %v2160_v3 = vrot.slane %v2009_v17, %v4372_v33 }
 0x130   :  { %v2144_v52 = vrot.slane %v2005_v25, %v4372_v33  ;;  %v3158_v5 = vrot.slane %v1851_v34, 10  ;;  %v1669_v58 = vadd.f32 %v4005_v2, %v1646_v38  ;;  %v2164_v20 = vrot.slane %v2010_v41, %v4372_v33 }
 0x131   :  { %v3155_v32 = vrot.slane %v1848_v15, 10  ;;  %v2007_v42 = vmax.f32 %v1847_v39, %v3154_v61  ;;  %v1857_v47 = vmax.f32 %v1687_v18, %v3132_v44  ;;  %v3159_v36 = vrot.slane %v4089_v14, 10  ;;  %v1623_v18 = vpop.f32.mrf.mxu0 }
 0x132   :  { %v2251_v30 = vsel %vm2237_vm15, %v2148_v57, %v2144_v52  ;;  %v1685_v43 = vmax.f32 %v1669_v58, 0.0  ;;  %v1649_v56 = vadd.f32 %v3374_v13, %v4037_v12  ;;  %v1858_v62 = vmax.f32 %v1719_v29, %v3133_v48 }
 0x133   :  { %v2008_v50 = vmax.f32 %v1848_v15, %v3155_v32  ;;  %v2152_v59 = vrot.slane %v2007_v42, %v4372_v33  ;;  %v1647_v7 = vadd.f32 %v1610_v60, %v4042_v35  ;;  %v4101_v4 = vmax.f32 %v1851_v34, %v3158_v5 }
 0x134   :  { %v1717_v37 = vcombine.high %v1685_v43, %v1685_v43  ;;  %v3128_v17 = vrot.slane %v1685_v43, 9  ;;  %v1672_v24 = vadd.f32 %v4005_v2, %v1649_v56  ;;  %v3164_v45 = vrot.slane %v1857_v47, 10 }
 0x135   :  { %v2156_v8 = vrot.slane %v2008_v50, %v4372_v33  ;;  %v2252_v40 = vsel %vm2239_vm0, %v2152_v59, %v2251_v30  ;;  %v1670_v12 = vadd.f32 %v4005_v2, %v1647_v7  ;;  %v1652_v29 = vadd.f32 %v3377_v23, %v4045_v51 }
 0x136   :  { %v3129_v13 = vrot.slane %v1717_v37, 9  ;;  %v1853_v6 = vmax.f32 %v1685_v43, %v3128_v17  ;;  %v1688_v16 = vmax.f32 %v1672_v24, 0.0  ;;  %v3165_v41 = vrot.slane %v1858_v62, 10 }
 0x137   :  { %v2253_v35 = vsel %vm2241_vm1, %v2156_v8, %v2252_v40  ;;  %v1686_v25 = vmax.f32 %v1670_v12, 0.0  ;;  %v1650_v34 = vadd.f32 %v1623_v18, %v4048_v49  ;;  %v1675_v52 = vadd.f32 %v4005_v2, %v1652_v29 }
 0x138   :  { %v2254_v38 = vsel %vm2243_vm4, %v2160_v3, %v2253_v35  ;;  %v1854_v60 = vmax.f32 %v1717_v37, %v3129_v13  ;;  %v3160_v11 = vrot.slane %v1853_v6, 10  ;;  %v1720_v55 = vcombine.high %v1688_v16, %v1688_v16 }
 0x139   :  { %v4112_v39 = vsel %vm2245_vm5, %v2164_v20, %v2254_v38  ;;  %v3134_v44 = vrot.slane %v1688_v16, 9  ;;  %v1718_v57 = vcombine.high %v1686_v25, %v1686_v25  ;;  %v3130_v15 = vrot.slane %v1686_v25, 9  ;;  %v3378_v20 = vpop.f32.mrf.mxu0 }
 0x13a   :  { %v3161_v61 = vrot.slane %v1854_v60, 10  ;;  %v2013_v48 = vmax.f32 %v1853_v6, %v3160_v11  ;;  %v3135_v51 = vrot.slane %v1720_v55, 9  ;;  %v1673_v3 = vadd.f32 %v4005_v2, %v1650_v34 }
 0x13b   :  { %v1859_v5 = vmax.f32 %v1688_v16, %v3134_v44  ;;  %v3131_v58 = vrot.slane %v1718_v57, 9  ;;  %v1855_v49 = vmax.f32 %v1686_v25, %v3130_v15  ;;  %v2017_v23 = vmax.f32 %v1857_v47, %v3164_v45  ;;  %v1626_v34 = vpop.f32.mrf.mxu0 }
 0x13c   :  { %v2014_v32 = vmax.f32 %v1854_v60, %v3161_v61  ;;  %v1860_v42 = vmax.f32 %v1720_v55, %v3135_v51  ;;  %v1691_v30 = vmax.f32 %v1675_v52, 0.0  ;;  %v1689_v59 = vmax.f32 %v1673_v3, 0.0 }
 0x13d   :  { %v3166_v43 = vrot.slane %v1859_v5, 10  ;;  %v1856_v56 = vmax.f32 %v1718_v57, %v3131_v58  ;;  %v3162_v50 = vrot.slane %v1855_v49, 10  ;;  %v2176_v7 = vrot.slane %v2013_v48, %v4372_v33 }
 0x13e   :  { %v2180_v37 = vrot.slane %v2014_v32, %v4372_v33  ;;  %v1723_v17 = vcombine.high %v1691_v30, %v1691_v30  ;;  %v3140_v24 = vrot.slane %v1691_v30, 9  ;;  %v1721_v40 = vcombine.high %v1689_v59, %v1689_v59 }
 0x13f   :  { %v3163_v18 = vrot.slane %v1856_v56, 10  ;;  %v2015_v8 = vmax.f32 %v1855_v49, %v3162_v50  ;;  %v1653_v47 = vadd.f32 %v3378_v20, %v4071_v21  ;;  %v2012_v45 = vmax.f32 %v4089_v14, %v3159_v36 }
 0x140   :  { %v2018_v12 = vmax.f32 %v1858_v62, %v3165_v41  ;;  %v2258_v13 = vsel %vm2237_vm15, %v2180_v37, %v2176_v7  ;;  %v3167_v6 = vrot.slane %v1860_v42, 10  ;;  %v2019_v16 = vmax.f32 %v1859_v5, %v3166_v43 }
 0x141   :  { %v2016_v29 = vmax.f32 %v1856_v56, %v3163_v18  ;;  %v2184_v35 = vrot.slane %v2015_v8, %v4372_v33  ;;  %v3136_v25 = vrot.slane %v1689_v59, 9  ;;  %v2192_v38 = vrot.slane %v2017_v23, %v4372_v33 }
 0x142   :  { %v3141_v60 = vrot.slane %v1723_v17, 9  ;;  %v1865_v11 = vmax.f32 %v1691_v30, %v3140_v24  ;;  %v3137_v55 = vrot.slane %v1721_v40, 9  ;;  %v1676_v36 = vadd.f32 %v4005_v2, %v1653_v47 }
 0x143   :  { %v2188_v44 = vrot.slane %v2016_v29, %v4372_v33  ;;  %v2259_v21 = vsel %vm2239_vm0, %v2184_v35, %v2258_v13  ;;  %v1861_v14 = vmax.f32 %v1689_v59, %v3136_v25  ;;  %v2196_v62 = vrot.slane %v2018_v12, %v4372_v33 }
 0x144   :  { %v2020_v41 = vmax.f32 %v1860_v42, %v3167_v6  ;;  %v1862_v57 = vmax.f32 %v1721_v40, %v3137_v55  ;;  %v1651_v15 = vadd.f32 %v1626_v34, %v4083_v0  ;;  %v2200_v61 = vrot.slane %v2019_v16, %v4372_v33 }
 0x145   :  { %v2260_v48 = vsel %vm2241_vm1, %v2188_v44, %v2259_v21  ;;  %v1692_v51 = vmax.f32 %v1676_v36, 0.0  ;;  %v2248_v52 = vsel %vm2247_vm6, %v2136_v31, %v4075_v53  ;;  %v1866_v58 = vmax.f32 %v1723_v17, %v3141_v60 }
 0x146   :  { %v2261_v5 = vsel %vm2243_vm4, %v2192_v38, %v2260_v48  ;;  %v3172_v49 = vrot.slane %v1865_v11, 10  ;;  %v3169_v3 = vrot.slane %v1862_v57, 10  ;;  %v3168_v32 = vrot.slane %v1861_v14, 10 }
 0x147   :  { %v2262_v23 = vsel %vm2245_vm5, %v2196_v62, %v2261_v5  ;;  %v1724_v0 = vcombine.high %v1692_v51, %v1692_v51  ;;  %v3142_v42 = vrot.slane %v1692_v51, 9  ;;  %v2168_v30 = vrot.slane %v4101_v4, %v4372_v33 }
 0x148   :  { %v2204_v20 = vrot.slane %v2020_v41, %v4372_v33  ;;  %v2263_v43 = vsel %vm2247_vm6, %v2200_v61, %v2262_v23  ;;  %v1674_v1 = vadd.f32 %v4005_v2, %v1651_v15  ;;  %v2172_v53 = vrot.slane %v2012_v45, %v4372_v33 }
 0x149   :  { %v2022_v31 = vmax.f32 %v1862_v57, %v3169_v3  ;;  %v3143_v56 = vrot.slane %v1724_v0, 9  ;;  %v4147_v50 = vsel %vm2249_vm7, %v2140_v46, %v2248_v52  ;;  %v3173_v59 = vrot.slane %v1866_v58, 10 }
 0x14a   :  { %v1690_v7 = vmax.f32 %v1674_v1, 0.0  ;;  %v2256_v4 = vsel %vm2247_vm6, %v2168_v30, %v4112_v39  ;;  %v4152_v37 = vsel %vm2249_vm7, %v2204_v20, %v2263_v43  ;;  %v2025_v17 = vmax.f32 %v1865_v11, %v3172_v49 }
 0x14b   :  { %v2021_v2 = vmax.f32 %v1861_v14, %v3168_v32  ;;  %v1867_v24 = vmax.f32 %v1692_v51, %v3142_v42  ;;  %v4155_v18 = vsel %vm2249_vm7, %v2172_v53, %v2256_v4  ;;  %v2315_v8 = vrot.slane %v4147_v50, 7 }
 0x14c   :  { %v1722_v19 = vcombine.high %v1690_v7, %v1690_v7  ;;  %v3138_v46 = vrot.slane %v1690_v7, 9  ;;  %v2316_v40 = vrot.slane %v4155_v18, 7  ;;  %v2212_v39 = vrot.slane %v2022_v31, %v4372_v33 }
 0x14d   :  { %v1868_v47 = vmax.f32 %v1724_v0, %v3143_v56  ;;  %v2317_v45 = vrot.slane %v4152_v37, 7  ;;  %v2276_v12 = vrot.slane %v4147_v50, 6  ;;  %v2277_v29 = vrot.slane %v4155_v18, 6 }
 0x14e   :  { %v3139_v13 = vrot.slane %v1722_v19, 9  ;;  %v1863_v6 = vmax.f32 %v1690_v7, %v3138_v46  ;;  %v4168_v16 = vsel %vm429_vm2, %v2315_v8, %v2316_v40  ;;  %v2026_v35 = vmax.f32 %v1866_v58, %v3173_v59 }
 0x14f   :  { %v2208_v25 = vrot.slane %v2021_v2, %v4372_v33  ;;  %v2320_v34 = vsel %vm429_vm2, %v2316_v40, %v2317_v45  ;;  %v2278_v38 = vrot.slane %v4152_v37, 6  ;;  %v3174_v60 = vrot.slane %v1867_v24, 10 }
 0x150   :  { %v1864_v11 = vmax.f32 %v1722_v19, %v3139_v13  ;;  %v3170_v55 = vrot.slane %v1863_v6, 10  ;;  %v4181_v44 = vsel %vm275_vm3, %v2276_v12, %v2277_v29  ;;  %v3175_v14 = vrot.slane %v1868_v47, 10 }
 0x151   :  { %v2265_v21 = vsel %vm2237_vm15, %v2212_v39, %v2208_v25  ;;  %v2281_v36 = vsel %vm275_vm3, %v2277_v29, %v2278_v38  ;;  %v2497_v62 = vpack.c.bf16 %v4155_v18, %v4147_v50  ;;  %v2563_v15 = vrot.slane %v4147_v50, 1 }
 0x152   :  { %v3171_v41 = vrot.slane %v1864_v11, 10  ;;  %v2023_v57 = vmax.f32 %v1863_v6, %v3170_v55  ;;  %v2564_v61 = vrot.slane %v4155_v18, 1  ;;  %v2565_v48 = vrot.slane %v4152_v37, 1 }
 0x153   :  { %v2665_v51 = vrot.slane %v4147_v50, 2  ;;  %v2666_v52 = vrot.slane %v4155_v18, 2  ;;  %v2667_v5 = vrot.slane %v4152_v37, 2  ;;  %v2027_v58 = vmax.f32 %v1867_v24, %v3174_v60  ;;  %v2878_v50 = vld [vmem:[%s4349_s5] sm:$0xf] }
 0x154   :  { %v2024_v49 = vmax.f32 %v1864_v11, %v3171_v41  ;;  %v2216_v3 = vrot.slane %v2023_v57, %v4372_v33  ;;  %v4197_v23 = vsel %vm1080_vm8, %v2563_v15, %v2564_v61  ;;  %v2028_v32 = vmax.f32 %v1868_v47, %v3175_v14 }
 0x155   :  { %v2568_v0 = vsel %vm1080_vm8, %v2564_v61, %v2565_v48  ;;  %v2670_v42 = vsel %vm1375_vm11, %v2666_v52, %v2667_v5  ;;  %v4205_v30 = vsel %vm1375_vm11, %v2665_v51, %v2666_v52  ;;  %v2224_v31 = vrot.slane %v2025_v17, %v4372_v33  ;;  %v3184_v61 = vld [vmem:[%s4347_s3 + $0xc] sm:$0xf] }
 0x156   :  { %v2220_v20 = vrot.slane %v2024_v49, %v4372_v33  ;;  %v2266_v43 = vsel %vm2239_vm0, %v2216_v3, %v2265_v21  ;;  %v4211_v1 = vsel %vm2580_vm9, %v2568_v0, 0.0  ;;  %v4215_v53 = vsel %vm2682_vm10, %v2670_v42, 0.0  ;;  %v3450_v49 = vld [vmem:[%s4351_s7 + $0x28] sm:$0xff]   ;;  %v3451_v3 = vld [vmem:[%s4351_s7 + $0x20] sm:$0xff]  }
 0x157   :  { %v2323_v56 = vadd.s32 4294967295, %v2033_v54  ;;  %v2599_v59 = vpack.c.bf16 %v4211_v1, %v4197_v23  ;;  %v2701_v7 = vpack.c.bf16 %v4215_v53, %v4205_v30  ;;  %v2228_v4 = vrot.slane %v2026_v35, %v4372_v33  ;;  %v3452_v23 = vld [vmem:[%s4351_s7 + $0x18] sm:$0xff]   ;;  %v3454_v0 = vld [vmem:[%s4351_s7 + $0x8] sm:$0xff]  }
 0x158   :  { %v2267_v22 = vsel %vm2241_vm1, %v2220_v20, %v2266_v43  ;;  %v2574_v2 = vadd.s32 1, %v2054_v28  ;;  %v2232_v17 = vrot.slane %v2027_v58, %v4372_v33  ;;  %v2236_v19 = vrot.slane %v2028_v32, %v4372_v33  ;;  %v3449_v58 = vld [vmem:[%s4351_s7 + $0x30] sm:$0xff]  }
 0x159   :  { %v2268_v24 = vsel %vm2243_vm4, %v2224_v31, %v2267_v22  ;;  %v2676_v40 = vadd.s32 2, %v2054_v28  ;;  %vm2327_vm12 = vcmp.ge.s32.totalorder %v2323_v56, 0  ;;  %vm2290_vm0 = vcmp.ge.s32.totalorder %v3998_v10, 0  ;;  %v3453_v32 = vld [vmem:[%s4351_s7 + $0x10] sm:$0xff]  }
 0x15a   :  { %v2269_v46 = vsel %vm2245_vm5, %v2228_v4, %v2268_v24  ;;  %vm2355_vm1 = vcmask 64512   ;;  %vm2288_vm9 = vcmp.ge.s32.totalorder %v2284_v26, 0  ;;  %vm2582_vm10 = vcmp.lt.s32.totalorder %v2574_v2, 16 }
 0x15b   :  { %v2270_v39 = vsel %vm2247_vm6, %v2232_v17, %v2269_v46  ;;  %v2349_v29 = vsel %vm2329_vm13, %v2320_v34, 0.0  ;;  %v2310_v63 = vsel %vm2290_vm0, %v2281_v36, 0.0  ;;  %vm2684_vm4 = vcmp.lt.s32.totalorder %v2676_v40, 16 }
 0x15c   :  { %v2271_v54 = vsel %vm2249_vm7, %v2236_v19, %v2270_v39  ;;  %v3478_v18 = vmov 0.0  }
 0x15d   :  { %v2318_v47 = vrot.slane %v2271_v54, 7  ;;  %v2279_v13 = vrot.slane %v2271_v54, 6  ;;  %v2498_v33 = vpack.c.bf16 %v2271_v54, %v4152_v37  ;;  %v2566_v6 = vrot.slane %v2271_v54, 1  ;;  %3415 = vmatprep.subr.bf16.mxu0 %v3478_v18 }
 0x15e   :  { %v2668_v28 = vrot.slane %v2271_v54, 2 }
 0x15f   :  { %v2322_v27 = vsel %vm429_vm2, %v2318_v47, %v2315_v8  ;;  %v2319_v10 = vsel %vm429_vm2, %v2317_v45, %v2318_v47  ;;  %v2283_v35 = vsel %vm275_vm3, %v2279_v13, %v2276_v12  ;;  %v2280_v25 = vsel %vm275_vm3, %v2278_v38, %v2279_v13  ;;  %v4373_v12 = vld [vmem:[#allocation5_spill] sm:$0xff] }
 0x160   :  { %v2347_v34 = vsel %vm2327_vm12, %v2322_v27, 0.0  ;;  %v2352_v60 = vpack.c.bf16 %v2319_v10, %v2349_v29  ;;  %v2308_v11 = vsel %vm2288_vm9, %v2283_v35, 0.0  ;;  %v2313_v55 = vpack.c.bf16 %v2280_v25, %v2310_v63 }
 0x161   :  { %v2351_v8 = vpack.c.bf16 %v4168_v16, %v2347_v34  ;;  %v2312_v37 = vpack.c.bf16 %v4181_v44, %v2308_v11  ;;  %v2567_v45 = vsel %vm1080_vm8, %v2565_v48, %v2566_v6  ;;  %v2570_v21 = vsel %vm1080_vm8, %v2566_v6, %v2563_v15  ;;  %v3181_v16 = vld [vmem:[%s4347_s3 + $0x8] sm:$0xf] }
 0x162   :  { %v2422_v14 = vsel %vm2362_vm14, %v4373_v12, 0  ;;  %v2598_v38 = vsel %vm2582_vm10, %v2570_v21, 0.0  ;;  %v2669_v36 = vsel %vm1375_vm11, %v2667_v5, %v2668_v28  ;;  %v2672_v41 = vsel %vm1375_vm11, %v2668_v28, %v2665_v51  ;;  %v3187_v51 = vld [vmem:[%s4347_s3 + $0x10] sm:$0xf]  ;;  %v3448_v5 = vld [vmem:[%s4351_s7 + $0x38] sm:$0xff]  }
 0x163   :  { %3381 = vmatprep.mubr.msk.bf16.mxu1 %vm2355_vm1, %v2351_v8  ;;  %v2600_v44 = vpack.c.bf16 %v2598_v38, %v2567_v45  ;;  %v2700_v57 = vsel %vm2684_vm4, %v2672_v41, 0.0  ;;  %v2508_v9 = vsel %vm2362_vm14, %v3181_v16, 0  ;;  %v2610_v48 = vsel %vm2362_vm14, %v3184_v61, 0  ;;  %3416 = vmatpush3.bf16.msra.mxu0 %v3448_v5 }
 0x164   :  { %3382 = vmatmul.mubr.msk.bf16.vlgmr.msra.gmra.mxu1 %vm2355_vm1, %v2352_v60  ;;  %v2702_v15 = vpack.c.bf16 %v2700_v57, %v2669_v36  ;;  %v2712_v52 = vsel %vm2362_vm14, %v3187_v51, 0  ;;  %vm3479_vm2 = vmmov 0   ;;  %3417 = vmatprep.subr.bf16.mxu0 %v3478_v18 }
 0x165   :  { %3386 = vmatpush3.bf16.msra.mxu1 %v2422_v14  ;;  %3387 = vmatprep.mubr.msk.bf16.mxu1 %vm2355_vm1, %v2312_v37 }
 0x166   :  { %3442 = vmatprep.subr.msk.bf16.mxu1 %vm2362_vm14, %v3181_v16  ;;  %3431 = vmatprep.mubr.msk.bf16.mxu0 %vm3479_vm2, %v3478_v18 }
 0x167   :  { %3418 = vmatpush3.bf16.msra.mxu0 %v3449_v58 }
 0x168   :  { %3419 = vmatprep.subr.bf16.mxu0 %v3478_v18 }
 0x16b   :  { %3420 = vmatpush3.bf16.msra.mxu0 %v3450_v49 }
 0x16c   :  { %3388 = vmatmul.mubr.msk.bf16.vlgmr.msra.gmra.mxu1 %vm2355_vm1, %v2313_v55  ;;  %3421 = vmatprep.subr.bf16.mxu0 %v3478_v18 }
 0x16d   :  { %3392 = vmatpush3.bf16.msra.mxu1 %v2508_v9  ;;  %3393 = vmatprep.mubr.msk.bf16.mxu1 %vm2355_vm1, %v2497_v62  ;;  %v2897_v62 = vsel %vm2362_vm14, %v2878_v50, 0 }
 0x16e   :  { %3443 = vmatprep.subr.msk.bf16.mxu1 %vm2362_vm14, %v3184_v61 }
 0x16f   :  { %3422 = vmatpush3.bf16.msra.mxu0 %v3451_v3 }
 0x170   :  { %3423 = vmatprep.subr.bf16.mxu0 %v3478_v18 }
 0x173   :  { %3424 = vmatpush3.bf16.msra.mxu0 %v3452_v23 }
 0x174   :  { %3394 = vmatmul.mubr.msk.bf16.vlgmr.msra.gmra.mxu1 %vm2355_vm1, %v2498_v33  ;;  %3425 = vmatprep.subr.bf16.mxu0 %v3478_v18  ;;  %v3190_v33 = vld [vmem:[%s4348_s4] ss:$0 sm:$0xff] }
 0x175   :  { %3398 = vmatpush3.bf16.msra.mxu1 %v2610_v48  ;;  %3399 = vmatprep.mubr.msk.bf16.mxu1 %vm2355_vm1, %v2599_v59 }
 0x176   :  { %3444 = vmatprep.subr.msk.bf16.mxu1 %vm2362_vm14, %v3187_v51 }
 0x177   :  { %3426 = vmatpush3.bf16.msra.mxu0 %v3453_v32 }
 0x178   :  { %3427 = vmatprep.subr.bf16.mxu0 %v3478_v18 }
 0x17b   :  { %3428 = vmatpush3.bf16.msra.mxu0 %v3454_v0 }
 0x17c   :  { %3400 = vmatmul.mubr.msk.bf16.vlgmr.msra.gmra.mxu1 %vm2355_vm1, %v2600_v44  ;;  %3429 = vmatprep.subr.bf16.mxu0 %v3478_v18 }
 0x17d   :  { %3404 = vmatpush3.bf16.msra.mxu1 %v2712_v52  ;;  %3405 = vmatprep.mubr.msk.bf16.mxu1 %vm2355_vm1, %v2701_v7 }
 0x17e   :  { %3409 = vmatprep.subr.bf16.mxu1 %v3478_v18 }
 0x184   :  { %3406 = vmatmul.mubr.msk.bf16.vlgmr.msra.gmra.mxu1 %vm2355_vm1, %v2702_v15 }
 0x185   :  { %3411 = vmatprep.mubr.msk.bf16.mxu1 %vm3479_vm2, %v3478_v18  ;;  %3410 = vmatpush3.bf16.msra.mxu1 %v2897_v62 }
 0x224   :  { %v3383_v42 = vpop.f32.mrf.mxu1 }
 0x226   :  { %v2400_v30 = vpop.f32.mrf.mxu1 }
 0x228   :  { %v3384_v20 = vpop.f32.mrf.mxu1 }
 0x22a   :  { %v2403_v43 = vpop.f32.mrf.mxu1 }
 0x22c   :  { %v3389_v1 = vpop.f32.mrf.mxu1 }
 0x22d   :  { %v2467_v17 = vadd.f32 %v3389_v1, %v3383_v42 }
 0x22e   :  { %v2458_v53 = vpop.f32.mrf.mxu1 }
 0x22f   :  { %v2459_v19 = vadd.f32 %v2458_v53, %v2400_v30 }
 0x230   :  { %v3390_v31 = vpop.f32.mrf.mxu1 }
 0x231   :  { %v2470_v39 = vadd.f32 %v3390_v31, %v3384_v20 }
 0x232   :  { %v2461_v56 = vpop.f32.mrf.mxu1 }
 0x233   :  { %v2462_v28 = vadd.f32 %v2461_v56, %v2403_v43 }
 0x234   :  { %v3395_v59 = vpop.f32.mrf.mxu1 }
 0x235   :  { %v2561_v46 = vadd.f32 %v3395_v59, %v2467_v17 }
 0x236   :  { %v2544_v7 = vpop.f32.mrf.mxu1 }
 0x237   :  { %v2559_v54 = vadd.f32 %v2544_v7, %v2459_v19 }
 0x238   :  { %v3396_v4 = vpop.f32.mrf.mxu1 }
 0x239   :  { %v2562_v6 = vadd.f32 %v3396_v4, %v2470_v39 }
 0x23a   :  { %v2547_v22 = vpop.f32.mrf.mxu1 }
 0x23b   :  { %v2560_v34 = vadd.f32 %v2547_v22, %v2462_v28 }
 0x23c   :  { %v3401_v26 = vpop.f32.mrf.mxu1 }
 0x23d   :  { %v2663_v47 = vadd.f32 %v3401_v26, %v2561_v46 }
 0x23e   :  { %v2646_v2 = vpop.f32.mrf.mxu1 }
 0x23f   :  { %v2661_v29 = vadd.f32 %v2646_v2, %v2559_v54 }
 0x240   :  { %v3402_v24 = vpop.f32.mrf.mxu1 }
 0x241   :  { %v2664_v10 = vadd.f32 %v3402_v24, %v2562_v6 }
 0x242   :  { %v2649_v40 = vpop.f32.mrf.mxu1 }
 0x243   :  { %v2662_v37 = vadd.f32 %v2649_v40, %v2560_v34  ;;  %v3455_v34 = vld [vmem:[%s4351_s7] sm:$0xff]  }
 0x244   :  { %v3407_v13 = vpop.f32.mrf.mxu1  ;;  %3430 = vmatpush3.bf16.msra.mxu0 %v3455_v34 }
 0x245   :  { %v2765_v63 = vadd.f32 %v3407_v13, %v2663_v47 }
 0x246   :  { %v2748_v27 = vpop.f32.mrf.mxu1 }
 0x247   :  { %v2776_v35 = vadd.f32 %v3190_v33, %v2765_v63  ;;  %v2763_v25 = vadd.f32 %v2748_v27, %v2661_v29 }
 0x248   :  { %v3408_v60 = vpop.f32.mrf.mxu1 }
 0x249   :  { %v2780_v11 = vmax.f32 %v2776_v35, 0.0  ;;  %v2774_v55 = vadd.f32 %v3190_v33, %v2763_v25  ;;  %v2766_v8 = vadd.f32 %v3408_v60, %v2664_v10  ;;  %v3207_v60 = vld [vmem:[%s4350_s6] ss:$0 sm:$0xff]  ;;  %s3456_s6 = scalar_lea.vmem %s3060_s16, 32 }
 0x24a   :  { %v2751_v45 = vpop.f32.mrf.mxu1  ;;  %p3457_p0 = scmp.ne.s32.totalorder %s3060_s16, %s3456_s6  ;;  %p3462_p2 = scmp.lt.s32.totalorder %s3456_s6, %s3456_s6 }
 0x24b   :  { %v2788_v21 = vcombine.high %v2780_v11, %v2780_v11  ;;  %v3195_v12 = vrot.slane %v2780_v11, 9  ;;  %v2778_v14 = vmax.f32 %v2774_v55, 0.0  ;;  %v2777_v38 = vadd.f32 %v3190_v33, %v2766_v8 }
 0x24c   :  { %v2764_v36 = vadd.f32 %v2751_v45, %v2662_v37  ;;  %p3463_p3 = por %p3462_p2, %p3461_p1 }
 0x24d   :  { %v3196_v41 = vrot.slane %v2788_v21, 9  ;;  %v2822_v16 = vmax.f32 %v2780_v11, %v3195_v12  ;;  %v2786_v44 = vcombine.high %v2778_v14, %v2778_v14  ;;  %v3191_v57 = vrot.slane %v2778_v14, 9 }
 0x24e   :  { %v2781_v15 = vmax.f32 %v2777_v38, 0.0  ;;  %v2775_v9 = vadd.f32 %v3190_v33, %v2764_v36  ;;  %p3464_p4 = pnand %p3463_p3, %p3457_p0 }
 0x24f   :  { %v2823_v61 = vmax.f32 %v2788_v21, %v3196_v41  ;;  %v3203_v48 = vrot.slane %v2822_v16, 10  ;;  %v3192_v51 = vrot.slane %v2786_v44, 9  ;;  %v2818_v52 = vmax.f32 %v2778_v14, %v3191_v57  ;;  %v3209_v14 = vld [vmem:[%s4352_s8] ss:$0 sm:$0xff] }
 0x250   :  { %v2789_v50 = vcombine.high %v2781_v15, %v2781_v15  ;;  %v3197_v18 = vrot.slane %v2781_v15, 9  ;;  %v2779_v62 = vmax.f32 %v2775_v9, 0.0 }
 0x251   :  { %v3204_v5 = vrot.slane %v2823_v61, 10  ;;  %v2819_v58 = vmax.f32 %v2786_v44, %v3192_v51  ;;  %v3199_v49 = vrot.slane %v2818_v52, 10  ;;  %v2862_v42 = vmax.f32 %v2822_v16, %v3203_v48 }
 0x252   :  { %v3198_v3 = vrot.slane %v2789_v50, 9  ;;  %v2824_v23 = vmax.f32 %v2781_v15, %v3197_v18  ;;  %v2787_v32 = vcombine.high %v2779_v62, %v2779_v62  ;;  %v3193_v0 = vrot.slane %v2779_v62, 9 }
 0x253   :  { %v2863_v30 = vmax.f32 %v2823_v61, %v3204_v5  ;;  %v3200_v20 = vrot.slane %v2819_v58, 10  ;;  %v2858_v59 = vmax.f32 %v2818_v52, %v3199_v49 }
 0x254   :  { %v2825_v43 = vmax.f32 %v2789_v50, %v3198_v3  ;;  %v3205_v1 = vrot.slane %v2824_v23, 10  ;;  %v3194_v53 = vrot.slane %v2787_v32, 9  ;;  %v2820_v31 = vmax.f32 %v2779_v62, %v3193_v0 }
 0x255   :  { %v2869_v56 = vadd.f32 %v2863_v30, %v2862_v42  ;;  %v2859_v7 = vmax.f32 %v2819_v58, %v3200_v20 }
 0x256   :  { %v3206_v4 = vrot.slane %v2825_v43, 10  ;;  %v2864_v22 = vmax.f32 %v2824_v23, %v3205_v1  ;;  %v2821_v26 = vmax.f32 %v2787_v32, %v3194_v53  ;;  %v3201_v2 = vrot.slane %v2820_v31, 10 }
 0x257   :  { %v2868_v17 = vadd.f32 %v2859_v7, %v2858_v59 }
 0x258   :  { %v2865_v24 = vmax.f32 %v2825_v43, %v3206_v4  ;;  %v2871_v19 = vadd.f32 %v2869_v56, %v2864_v22  ;;  %v3202_v46 = vrot.slane %v2821_v26, 10  ;;  %v2860_v40 = vmax.f32 %v2820_v31, %v3201_v2 }
 0x25a   :  { %v2873_v39 = vadd.f32 %v2871_v19, %v2865_v24  ;;  %v2861_v54 = vmax.f32 %v2821_v26, %v3202_v46  ;;  %v2870_v47 = vadd.f32 %v2868_v17, %v2860_v40 }
 0x25c   :  { %v2875_v13 = vmul.f32 0.25, %v2873_v39  ;;  %v2872_v33 = vadd.f32 %v2870_v47, %v2861_v54 }
 0x25e   :  { %v2877_v6 = vpack.c.bf16 %v2875_v13, %v2875_v13  ;;  %v2874_v29 = vmul.f32 0.25, %v2872_v33 }
 0x260   :  { %v2889_v63 = vunpack.c.l.b16 %v2877_v6  ;;  %v2876_v28 = vpack.c.bf16 %v2874_v29, %v2874_v29 }
 0x262   :  { %v2890_v27 = vrot.slane %v2889_v63, 7  ;;  %v2888_v10 = vunpack.c.l.b16 %v2876_v28 }
 0x264   :  { %v2891_v35 = vsel %vm2237_vm15, %v2890_v27, %v2888_v10 }
 0x265   :  { %v2892_v25 = vpack.c.b16 %v2891_v35, %v2891_v35 }
 0x267   :  { %3412 = vmatmul.mubr.msk.bf16.vlgmr.msra.gmra.mxu1 %vm2355_vm1, %v2892_v25 }
 0x327   :  { %v2933_v11 = vpop.f32.mrf.mxu1 }
 0x328   :  { %v2934_v55 = vadd.f32 %v3207_v60, %v2933_v11 }
 0x329   :  { %v3413_v8 = vpop.f32.mrf.mxu1 }
 0x32a   :  { %v2939_v37 = vmax.f32 %v2934_v55, 0.0 }
 0x32b   :  { %v2936_v45 = vpop.f32.mrf.mxu1 }
 0x32c   :  { %v2940_v21 = vpack.c.bf16 %v2939_v37, %v2939_v37 }
 0x32d   :  { %v3414_v12 = vpop.f32.mrf.mxu1 }
 0x32e   :  { %3432 = vmatmul.mubr.bf16.vlgmr.msra.gmra.mxu0 %v2940_v21 }
 0x3ee   :  { %v3046_v38 = vpop.f32.mrf.mxu0 }
 0x3ef   :  { %v3047_v36 = vadd.f32 %v3209_v14, %v3046_v38 }
 0x3f0   :  { %v3433_v41 = vpop.f32.mrf.mxu0 }
 0x3f1   :  { %3052 = vst [vmem:[#allocation2] sm:$0x3] %v3047_v36 }
 0x3f2   :  { %v3049_v16 = vpop.f32.mrf.mxu0 }
 0x3f3   :  { %3467 = shalt.err (!%p3464_p4)
}
 0x3f4   :  { %3062 = dma.vmem_to_hbm [thread:$0]  %s3060_s16, 32, %s4353_s9, [#allocation3]   ;;  %v3434_v44 = vpop.f32.mrf.mxu0 }
 0x3f5   :  { %3476 = dma.done.wait [#allocation3], 32  }
 0x3f6   :  { %3477 = vsyncadd [#allocation3], 4294967264 }
 0x3f7   :  { %3066 = vsyncpa [#allocation3], 1 }

</bundles_post_ra>
